<compile_context>
chip_gen: v6e
topology: v6e:2x2x1
jax: 0.10.0
libtpu: 0.0.40
codegen_flags: <defaults>
</compile_context>

<pallas_src>
import jax
import jax.numpy as jnp
from jax.experimental import pallas as pl
from jax.experimental.pallas import tpu as pltpu

_CELU_ALPHA = 0.1  # torchani uses CELU(alpha=0.1)


def _nnp_flatten_kernel(x_ref, w1_ref, b1_ref, w2_ref, b2_ref, o_ref):
    # In-kernel f32 -> bf16 cast of the activation tile (VPU; hidden under the
    # input DMA / MXU slots -- cheaper than a wrapper-side cast pass).
    x = x_ref[...].astype(w1_ref.dtype)
    # layer 1: MXU matmul (bf16 operands, f32 accumulation) + f32 bias
    h = jnp.dot(x, w1_ref[...], preferred_element_type=jnp.float32)
    h = h + b1_ref[...]
    # CELU(alpha) in f32 on VPU/EUP (overflow-safe: exp only of the
    # non-positive part).  f32 exp is also fine on v5e's non-bf16 EUP.
    neg = jnp.minimum(h, 0.0)
    h = jnp.maximum(h, 0.0) + _CELU_ALPHA * (
        jnp.exp(neg * (1.0 / _CELU_ALPHA)) - 1.0)
    # layer 2: cast activation to bf16 for the MXU, accumulate in f32, add the
    # bias once in the f32 epilogue, store a lane-dense (tm, 128) block in the
    # (bf16) output dtype -> unmasked vst, half the writeback bytes of f32.
    y = jnp.dot(h.astype(w2_ref.dtype), w2_ref[...],
                preferred_element_type=jnp.float32)
    o_ref[...] = (y + b2_ref[...]).astype(o_ref.dtype)


def flatten_module(x, w1, b1, w2, b2, *, tm=512, out_dtype=jnp.bfloat16,
                   core_parallel=False):
    """Equivalent of Flatten(model)(x) == model(x).flatten(), fully fused.

    x is f32 (or bf16); weights bf16; biases f32.  Any batch size B is
    accepted (padded up to a whole number of tm-row tiles, padding sliced off
    before the metadata-only flatten).
    """
    B, d_in = x.shape
    d_hid = w1.shape[1]
    d_out = w2.shape[1]

    # Arbitrary B: pad the batch to a whole number of tm-row tiles.
    n_tiles = pl.cdiv(B, tm)
    B_pad = n_tiles * tm
    if B_pad != B:
        x = jnp.pad(x, ((0, B_pad - B), (0, 0)))

    # Weights/biases: whole arrays resident in VMEM (single auto-DMA, no
    # re-fetch per M tile).  x / out: pipelined tm-row tiles over the grid.
    vmem_full = pl.BlockSpec(memory_space=pltpu.MemorySpace.VMEM)

    # Explicit VMEM budget (also valid on v7x's 64 MiB part): double-buffered
    # x + out tiles + resident weights/biases, 2x safety factor + 8 MiB slack.
    tile_bytes = 2 * (tm * d_in * x.dtype.itemsize
                      + tm * d_out * jnp.dtype(out_dtype).itemsize)
    weight_bytes = (w1.size * w1.dtype.itemsize + b1.size * b1.dtype.itemsize
                    + w2.size * w2.dtype.itemsize + b2.size * b2.dtype.itemsize)
    vmem_limit = int(2 * (tile_bytes + weight_bytes)) + (8 << 20)

    # v7x: CORE_PARALLEL shards the M tiles across the two TensorCores
    # (plain "parallel" has ~zero measured effect).  Off by default so the
    # kernel stays portable to single-TC v5e/v6e.
    m_semantics = pltpu.CORE_PARALLEL if core_parallel else "parallel"

    # TODO(synk): at real ANI sizes (d_out often 1 per molecule) the (tm,d_out)
    # out block degrades to masked vst.msk; restructure so the batch axis is
    # the lane axis of the output block (e.g. a (1, tm) lane-dense slab per
    # step), and add a K-reduction grid axis + f32 VMEM accumulator when
    # d_in/d_hid grow beyond a single VMEM-resident tile.
    y2d = pl.pallas_call(
        _nnp_flatten_kernel,
        out_shape=jax.ShapeDtypeStruct((B_pad, d_out), out_dtype),
        grid_spec=pltpu.PrefetchScalarGridSpec(
            num_scalar_prefetch=0,
            grid=(n_tiles,),
            in_specs=[
                pl.BlockSpec((tm, d_in), lambda i: (i, 0)),  # x rows, pipelined
                vmem_full,                                    # w1 resident
                vmem_full,                                    # b1 resident
                vmem_full,                                    # w2 resident
                vmem_full,                                    # b2 resident
            ],
            out_specs=pl.BlockSpec((tm, d_out), lambda i: (i, 0)),
        ),
        compiler_params=pltpu.CompilerParams(
            dimension_semantics=(m_semantics,),
            vmem_limit_bytes=vmem_limit,
        ),
    )(x, w1, b1, w2, b2)

    if B_pad != B:
        y2d = y2d[:B]
    # torch .flatten(): row-major reshape to 1-D.  The kernel output is a
    # contiguous lane-dense (B, 128) slab, so this is pure metadata.
    return y2d.reshape(-1)


def _reference(x, w1, b1, w2, b2, out_dtype=jnp.bfloat16):
    """Plain-JAX reference of model(x).flatten() with matching numerics."""
    h = jnp.dot(x.astype(w1.dtype), w1,
                preferred_element_type=jnp.float32) + b1
    neg = jnp.minimum(h, 0.0)
    h = jnp.maximum(h, 0.0) + _CELU_ALPHA * (
        jnp.exp(neg * (1.0 / _CELU_ALPHA)) - 1.0)
    y = jnp.dot(h.astype(w2.dtype), w2,
                preferred_element_type=jnp.float32) + b2
    return y.astype(out_dtype).reshape(-1)


if __name__ == "__main__":
    key = jax.random.PRNGKey(0)
    kx, kw1, kb1, kw2, kb2 = jax.random.split(key, 5)

    # Small synthetic ANI-style shapes; N sized to fill MXU lanes (128) and
    # make the output slab lane-dense.
    B, D_IN, D_HID, D_OUT = 1024, 64, 128, 128

    x = jax.random.normal(kx, (B, D_IN), dtype=jnp.float32)      # f32 activations
    # Stored model parameters: weights kept in bf16 (one-time conversion at
    # parameter setup, not per forward), biases in f32.
    w1 = (jax.random.normal(kw1, (D_IN, D_HID), dtype=jnp.float32)
          * 0.1).astype(jnp.bfloat16)
    b1 = jax.random.normal(kb1, (1, D_HID), dtype=jnp.float32) * 0.1
    w2 = (jax.random.normal(kw2, (D_HID, D_OUT), dtype=jnp.float32)
          * 0.1).astype(jnp.bfloat16)
    b2 = jax.random.normal(kb2, (1, D_OUT), dtype=jnp.float32) * 0.1

    # --- divisible batch (grid of 2 x 512-row tiles) -----------------------
    out = jax.block_until_ready(flatten_module(x, w1, b1, w2, b2))
    ref = _reference(x, w1, b1, w2, b2)
    assert out.shape == (B * D_OUT,), out.shape
    assert out.dtype == jnp.bfloat16, out.dtype
    err = float(jnp.max(jnp.abs(out.astype(jnp.float32)
                                - ref.astype(jnp.float32))))
    assert err < 3e-2, err

    # --- non-divisible batch (exercises the padded-tail path) --------------
    B2 = 300
    x2 = x[:B2]
    out2 = jax.block_until_ready(flatten_module(x2, w1, b1, w2, b2))
    ref2 = _reference(x2, w1, b1, w2, b2)
    assert out2.shape == (B2 * D_OUT,), out2.shape
    err2 = float(jnp.max(jnp.abs(out2.astype(jnp.float32)
                                 - ref2.astype(jnp.float32))))
    assert err2 < 3e-2, err2

    print("KERNEL_OK")
</pallas_src>

<mosaic_0001>
module attributes {stable_mosaic.version = 11 : i64} {
  func.func @_nnp_flatten_kernel(%arg0: i32, %arg1: memref<512x64xf32, #tpu.memory_space<vmem>>, %arg2: memref<64x128xbf16, #tpu.memory_space<vmem>>, %arg3: memref<1x128xf32, #tpu.memory_space<vmem>>, %arg4: memref<128x128xbf16, #tpu.memory_space<vmem>>, %arg5: memref<1x128xf32, #tpu.memory_space<vmem>>, %arg6: memref<512x128xbf16, #tpu.memory_space<vmem>>) attributes {dimension_semantics = [#tpu.dimension_semantics<parallel>], iteration_bounds = array<i64: 2>, scalar_prefetch = 0 : i64, scratch_operands = 0 : i64, tpu.core_type = #tpu.core_type<tc>, window_params = [{transform_indices = @transform_0, window_bounds = array<i64: 512, 64>}, {pipeline_mode = #tpu.pipeline_mode<synchronous>, transform_indices = @transform_1, window_bounds = array<i64: 64, 128>}, {pipeline_mode = #tpu.pipeline_mode<synchronous>, transform_indices = @transform_2, window_bounds = array<i64: 1, 128>}, {pipeline_mode = #tpu.pipeline_mode<synchronous>, transform_indices = @transform_3, window_bounds = array<i64: 128, 128>}, {pipeline_mode = #tpu.pipeline_mode<synchronous>, transform_indices = @transform_4, window_bounds = array<i64: 1, 128>}, {transform_indices = @transform_5, window_bounds = array<i64: 512, 128>}]} {
    %c0 = arith.constant 0 : index
    %c0_0 = arith.constant 0 : index
    %0 = vector.load %arg1[%c0, %c0_0] : memref<512x64xf32, #tpu.memory_space<vmem>>, vector<512x64xf32>
    %1 = arith.truncf %0 : vector<512x64xf32> to vector<512x64xbf16>
    %c0_1 = arith.constant 0 : index
    %c0_2 = arith.constant 0 : index
    %2 = vector.load %arg2[%c0_1, %c0_2] : memref<64x128xbf16, #tpu.memory_space<vmem>>, vector<64x128xbf16>
    %cst = arith.constant dense<0.000000e+00> : vector<512x128xf32>
    %3 = tpu.matmul %1, %2, %cst {dimension_numbers = #tpu.dot_dimension_numbers<[1], [0], [0], [1], [0, 0, 1, 1], [], []>} : vector<512x64xbf16>, vector<64x128xbf16>, vector<512x128xf32> -> vector<512x128xf32>
    %c0_3 = arith.constant 0 : index
    %c0_4 = arith.constant 0 : index
    %4 = vector.load %arg3[%c0_3, %c0_4] : memref<1x128xf32, #tpu.memory_space<vmem>>, vector<1x128xf32>
    %5 = vector.broadcast %4 : vector<1x128xf32> to vector<512x128xf32>
    %6 = arith.addf %3, %5 : vector<512x128xf32>
    %cst_5 = arith.constant 0.000000e+00 : f32
    %7 = vector.broadcast %cst_5 : f32 to vector<512x128xf32>
    %8 = arith.minimumf %6, %7 : vector<512x128xf32>
    %cst_6 = arith.constant 0.000000e+00 : f32
    %9 = vector.broadcast %cst_6 : f32 to vector<512x128xf32>
    %10 = arith.maximumf %6, %9 : vector<512x128xf32>
    %cst_7 = arith.constant 1.000000e+01 : f32
    %11 = vector.broadcast %cst_7 : f32 to vector<512x128xf32>
    %12 = arith.mulf %8, %11 : vector<512x128xf32>
    %13 = math.exp %12 : vector<512x128xf32>
    %cst_8 = arith.constant 1.000000e+00 : f32
    %14 = vector.broadcast %cst_8 : f32 to vector<512x128xf32>
    %15 = arith.subf %13, %14 : vector<512x128xf32>
    %cst_9 = arith.constant 1.000000e-01 : f32
    %16 = vector.broadcast %cst_9 : f32 to vector<512x128xf32>
    %17 = arith.mulf %16, %15 : vector<512x128xf32>
    %18 = arith.addf %10, %17 : vector<512x128xf32>
    %19 = arith.truncf %18 : vector<512x128xf32> to vector<512x128xbf16>
    %c0_10 = arith.constant 0 : index
    %c0_11 = arith.constant 0 : index
    %20 = vector.load %arg4[%c0_10, %c0_11] : memref<128x128xbf16, #tpu.memory_space<vmem>>, vector<128x128xbf16>
    %cst_12 = arith.constant dense<0.000000e+00> : vector<512x128xf32>
    %21 = tpu.matmul %19, %20, %cst_12 {dimension_numbers = #tpu.dot_dimension_numbers<[1], [0], [0], [1], [0, 0, 1, 1], [], []>} : vector<512x128xbf16>, vector<128x128xbf16>, vector<512x128xf32> -> vector<512x128xf32>
    %c0_13 = arith.constant 0 : index
    %c0_14 = arith.constant 0 : index
    %22 = vector.load %arg5[%c0_13, %c0_14] : memref<1x128xf32, #tpu.memory_space<vmem>>, vector<1x128xf32>
    %23 = vector.broadcast %22 : vector<1x128xf32> to vector<512x128xf32>
    %24 = arith.addf %21, %23 : vector<512x128xf32>
    %25 = arith.truncf %24 : vector<512x128xf32> to vector<512x128xbf16>
    %c0_15 = arith.constant 0 : index
    %c0_16 = arith.constant 0 : index
    %26 = vector.load %arg6[%c0_15, %c0_16] : memref<512x128xbf16, #tpu.memory_space<vmem>>, vector<512x128xbf16>
    tpu.vector_store %arg6[%c0_15, %c0_16], %25 {strides = array<i32>} : memref<512x128xbf16, #tpu.memory_space<vmem>>, vector<512x128xbf16>,
    return
  }
  func.func @transform_0(%arg0: i32) -> (i32, i32) {
    %c0_i32 = arith.constant 0 : i32
    %c0_i32_0 = arith.constant 0 : i32
    return %arg0, %c0_i32 : i32, i32
  }
  func.func @transform_1(%arg0: i32) -> (i32, i32) {
    %c0_i32 = arith.constant 0 : i32
    %c0_i32_0 = arith.constant 0 : i32
    %c0_i32_1 = arith.constant 0 : i32
    return %c0_i32, %c0_i32_0 : i32, i32
  }
  func.func @transform_2(%arg0: i32) -> (i32, i32) {
    %c0_i32 = arith.constant 0 : i32
    %c0_i32_0 = arith.constant 0 : i32
    %c0_i32_1 = arith.constant 0 : i32
    return %c0_i32, %c0_i32_0 : i32, i32
  }
  func.func @transform_3(%arg0: i32) -> (i32, i32) {
    %c0_i32 = arith.constant 0 : i32
    %c0_i32_0 = arith.constant 0 : i32
    %c0_i32_1 = arith.constant 0 : i32
    return %c0_i32, %c0_i32_0 : i32, i32
  }
  func.func @transform_4(%arg0: i32) -> (i32, i32) {
    %c0_i32 = arith.constant 0 : i32
    %c0_i32_0 = arith.constant 0 : i32
    %c0_i32_1 = arith.constant 0 : i32
    return %c0_i32, %c0_i32_0 : i32, i32
  }
  func.func @transform_5(%arg0: i32) -> (i32, i32) {
    %c0_i32 = arith.constant 0 : i32
    %c0_i32_0 = arith.constant 0 : i32
    return %arg0, %c0_i32 : i32, i32
  }
}

</mosaic_0001>

<bundles_post_ra>
// kernel: tpu_custom_call.1
= control target key start
LH: loop header
LB: loop body
LE: loop exit
PB: predicated region body
PF: predicated region fallthrough
CT: control target
= control target key end

     0   :  { %10 = vsyncpa [#allocation3], 0  ;;  %s3828_s0 = inlined_call_operand.vmem [shape: f32[1024,64], index: 0, kind: input, shape index: {}]   ;;  %s3829_s1 = inlined_call_operand.vmem [shape: bf16[64,128], index: 1, kind: input, shape index: {}]   ;;  %s3830_s2 = inlined_call_operand.vmem [shape: f32[1,128], index: 2, kind: input, shape index: {}]   ;;  %s3831_s3 = inlined_call_operand.vmem [shape: bf16[128,128], index: 3, kind: input, shape index: {}]   ;;  %s3832_s4 = inlined_call_operand.vmem [shape: f32[1,128], index: 4, kind: input, shape index: {}]   ;;  %s3833_s5 = inlined_call_operand.hbm [shape: bf16[1024,128], index: 5, kind: output, shape index: {}]  }
   0x1   :  { %12 = vsyncpa [#allocation3 + $0x1], 0  ;;  %s3011_s18 = smov 0   ;;  %s3013_s19 = smov 0  }
   0x2   :  { %s3015_s20 = smov 0   ;;  %s3017_s21 = smov 0  }
   0x3 LB: > { %s3032_s22 = sadd.s32 4294967295, %s2976_s21   ;;  %s2048_s23 = sadd.s32 4294967294, %s2976_s21   ;;  %s2976_s21 = sphi %s3017_s21, %s3839_s21   ;;  %s2972_s20 = sphi %s3015_s20, %s3838_s20   ;;  %s2968_s19 = sphi %s3013_s19, %s3837_s19   ;;  %s2964_s18 = sphi %s3011_s18, %s3836_s18  }
   0x4   : > { %s3036_s24 = sadd.s32 1, %s2976_s21   ;;  %s135_s25 = sadd.s32 1, %s2972_s20 }
   0x5   : > { %s132_s26 = ssub.s32 %s2976_s21, %s3036_s24  ;;  %p145_p0 = scmp.ne.s32.totalorder %s2972_s20, %s2968_s19 }
   0x6   : > { %p133_p1 = scmp.eq.s32.totalorder %s132_s26, 0  ;;  %p146_p2 = scmp.eq.s32.totalorder %s3032_s22, 1 }
   0x7   : > { %p151_p3 = scmp.ne.s32.totalorder %s2968_s19, %s2964_s18  ;;  %p152_p4 = scmp.eq.s32.totalorder %s2048_s23, 1 }
   0x8   : > { %s3047_s27 = scalar_select %p133_p1, %s2972_s20, %s135_s25  }
   0x9   : > { %p3049_p5 = por %p146_p2, %p145_p0  ;;  %p3053_p6 = por %p152_p4, %p151_p3 }
   0xa   : > { %p2051_p7 = scmp.ge.s32.totalorder %s2976_s21, 1  ;;  %p191_p8 = scmp.lt.s32.totalorder %s2976_s21, 3 }
   0xc   : > { %p192_p9 = pnand %p2051_p7, %p191_p8 }
   0xd   : > { %s2053_s7 = sshll.u32 (!%p192_p9), %s3032_s22, 6  ;;  %s216_s6 = sand.u32 (!%p192_p9), 1, %s2968_s19  }
   0xe   : > { %195 = sbr.rel (%p192_p9) target bundleno = 624 (0x270), region = 40  ;;  %p220_p10 = scmp.lt.s32.totalorder (!%p192_p9), %s2053_s7, 127 }
   0xf   : > { %s2052_s9 = sshll.u32 (!%p192_p9), %s216_s6, 8  ;;  %s2298_s11 = sshll.u32 (!%p192_p9), %s3032_s22, 12 }
  0x10   : > { %s3683_s10 = scalar_lea.vmem (!%p192_p9), [#allocation2], %s2052_s9  ;;  %s3780_s16 = scalar_lea.hbm (!%p192_p9), %s3833_s5, %s2298_s11 }
  0x11   : > { %s3788_s22 = scalar_lea.sflag (!%p192_p9), [#allocation3], %s216_s6  ;;  %s2978_s23 = smov (!%p192_p9), [#allocation2]  }
  0x12   : > { %s2920_s25 = sshll.u32 (!%p192_p9), %s2978_s23, 4  ;;  %s2921_s25 = int_to_ptr.vmem [resolvable:$false] %s2920_s25 }
  0x13   : > { %v2775_v0 = vld [vmem:[%s3829_s1 + $0x18] sm:$0xff]   ;;  %v2776_v1 = vld [vmem:[%s3829_s1 + $0x10] sm:$0xff]   ;;  %v2777_v2 = vld [vmem:[%s3829_s1 + $0x8] sm:$0xff]   ;;  %s3841_s7 = smov (!%p220_p10, %s2053_s7), 127  ;;  %vm362_vm0 = vcmask 523264   ;;  %s2922_s26 = scalar_lea.vmem %s2921_s25, 8192 }
  0x14   : > { %2566 = vmatprep.subr.bf16.mxu0 %v2775_v0  ;;  %s2054_s12 = sshll.u32 %s3841_s7, 3  ;;  %v2778_v5 = vld [vmem:[%s3829_s1] sm:$0xff]  }
  0x15   : > { %2567 = vmatpush3.bf16.msra.mxu0 %v2775_v0  ;;  %s3072_s15 = scalar_lea.vmem %s3828_s0, %s2054_s12  ;;  %s1986_s12 = sshll.u32 %s3683_s10, 4  ;;  %s3782_s12 = int_to_ptr.vmem [resolvable:$true] %s1986_s12 }
  0x16   : > { %2568 = vmatprep.subr.bf16.mxu0 %v2776_v1  ;;  %v227_v3 = vld [vmem:[%s3072_s15] sm:$0xff]  ;;  %v228_v4 = vld [vmem:[%s3072_s15 + $0x8] sm:$0xff]  ;;  %v229_v7 = vld [vmem:[%s3072_s15 + $0x10] sm:$0xff]  ;;  %s2916_s17 = scalar_lea.vmem %s3782_s12, 4096  ;;  %p2923_p0 = scmp.lt.s32.totalorder %s3782_s12, %s2921_s25 }
  0x17   : > { %v291_v6 = vpack.c.bf16 %v228_v4, %v227_v3  ;;  %v230_v8 = vld [vmem:[%s3072_s15 + $0x18] sm:$0xff]  ;;  %v231_v9 = vld [vmem:[%s3072_s15 + $0x20] sm:$0xff]  ;;  %v232_v10 = vld [vmem:[%s3072_s15 + $0x28] sm:$0xff]  ;;  %p2917_p11 = scmp.ne.s32.totalorder %s3782_s12, %s2916_s17  ;;  %p2924_p1 = scmp.lt.s32.totalorder %s2922_s26, %s2916_s17 }
  0x18   : > { %v292_v11 = vpack.c.bf16 %v230_v8, %v229_v7  ;;  %v293_v12 = vpack.c.bf16 %v232_v10, %v231_v9  ;;  %v233_v13 = vld [vmem:[%s3072_s15 + $0x30] sm:$0xff]  ;;  %v234_v14 = vld [vmem:[%s3072_s15 + $0x38] sm:$0xff]  ;;  %v235_v15 = vld [vmem:[%s3072_s15 + $0x40] sm:$0xff] }
  0x19   : > { %2569 = vmatpush3.bf16.msra.mxu0 %v2776_v1  ;;  %2574 = vmatprep.mubr.msk.bf16.mxu0 %vm362_vm0, %v291_v6  ;;  %v236_v16 = vld [vmem:[%s3072_s15 + $0x48] sm:$0xff]  ;;  %v294_v17 = vpack.c.bf16 %v234_v14, %v233_v13  ;;  %v237_v19 = vld [vmem:[%s3072_s15 + $0x50] sm:$0xff]  ;;  %v238_v20 = vld [vmem:[%s3072_s15 + $0x58] sm:$0xff]  ;;  %p2918_p12 = pnand %p2917_p11, %p3049_p5  ;;  %p2925_p2 = por %p2924_p1, %p2923_p0 }
  0x1a   : > { %2570 = vmatprep.subr.bf16.mxu0 %v2777_v2  ;;  %v295_v18 = vpack.c.bf16 %v236_v16, %v235_v15  ;;  %v239_v21 = vld [vmem:[%s3072_s15 + $0x60] sm:$0xff]  ;;  %v240_v22 = vld [vmem:[%s3072_s15 + $0x68] sm:$0xff]  ;;  %v296_v23 = vpack.c.bf16 %v238_v20, %v237_v19  ;;  %v241_v25 = vld [vmem:[%s3072_s15 + $0x70] sm:$0xff] }
  0x1b   : > { %v297_v24 = vpack.c.bf16 %v240_v22, %v239_v21  ;;  %v242_v26 = vld [vmem:[%s3072_s15 + $0x78] sm:$0xff]  ;;  %v243_v27 = vld [vmem:[%s3072_s15 + $0x80] sm:$0xff]  ;;  %v244_v28 = vld [vmem:[%s3072_s15 + $0x88] sm:$0xff]  ;;  %p2919_p13 = pneg %p2918_p12 }
  0x1c   : > { %v298_v29 = vpack.c.bf16 %v242_v26, %v241_v25  ;;  %v299_v30 = vpack.c.bf16 %v244_v28, %v243_v27  ;;  %v245_v31 = vld [vmem:[%s3072_s15 + $0x90] sm:$0xff]  ;;  %v246_v32 = vld [vmem:[%s3072_s15 + $0x98] sm:$0xff]  ;;  %v247_v33 = vld [vmem:[%s3072_s15 + $0xa0] sm:$0xff] }
  0x1d   : > { %2571 = vmatpush3.bf16.msra.mxu0 %v2777_v2  ;;  %v248_v34 = vld [vmem:[%s3072_s15 + $0xa8] sm:$0xff]  ;;  %v300_v35 = vpack.c.bf16 %v246_v32, %v245_v31  ;;  %v249_v37 = vld [vmem:[%s3072_s15 + $0xb0] sm:$0xff]  ;;  %v250_v38 = vld [vmem:[%s3072_s15 + $0xb8] sm:$0xff]  ;;  %p2926_p3 = pnand %p2925_p2, %p2919_p13 }
  0x1e   : > { %2572 = vmatprep.subr.bf16.mxu0 %v2778_v5  ;;  %v301_v36 = vpack.c.bf16 %v248_v34, %v247_v33  ;;  %v251_v39 = vld [vmem:[%s3072_s15 + $0xc0] sm:$0xff]  ;;  %v252_v40 = vld [vmem:[%s3072_s15 + $0xc8] sm:$0xff]  ;;  %v302_v41 = vpack.c.bf16 %v250_v38, %v249_v37  ;;  %v253_v43 = vld [vmem:[%s3072_s15 + $0xd0] sm:$0xff] }
  0x1f   : > { %v303_v42 = vpack.c.bf16 %v252_v40, %v251_v39  ;;  %v254_v44 = vld [vmem:[%s3072_s15 + $0xd8] sm:$0xff]  ;;  %v255_v45 = vld [vmem:[%s3072_s15 + $0xe0] sm:$0xff]  ;;  %v256_v46 = vld [vmem:[%s3072_s15 + $0xe8] sm:$0xff] }
  0x20   : > { %v304_v47 = vpack.c.bf16 %v254_v44, %v253_v43  ;;  %v305_v48 = vpack.c.bf16 %v256_v46, %v255_v45  ;;  %v257_v49 = vld [vmem:[%s3072_s15 + $0xf0] sm:$0xff]  ;;  %v258_v50 = vld [vmem:[%s3072_s15 + $0xf8] sm:$0xff]  ;;  %v259_v51 = vld [vmem:[%s3072_s15 + $0x100] sm:$0xff] }
  0x21   : > { %2573 = vmatpush3.bf16.msra.mxu0 %v2778_v5  ;;  %v260_v52 = vld [vmem:[%s3072_s15 + $0x108] sm:$0xff]  ;;  %v306_v53 = vpack.c.bf16 %v258_v50, %v257_v49  ;;  %v261_v55 = vld [vmem:[%s3072_s15 + $0x110] sm:$0xff]  ;;  %v262_v56 = vld [vmem:[%s3072_s15 + $0x118] sm:$0xff] }
  0x22   : > { %v307_v54 = vpack.c.bf16 %v260_v52, %v259_v51  ;;  %v263_v57 = vld [vmem:[%s3072_s15 + $0x120] sm:$0xff]  ;;  %v264_v58 = vld [vmem:[%s3072_s15 + $0x128] sm:$0xff]  ;;  %v308_v59 = vpack.c.bf16 %v262_v56, %v261_v55  ;;  %v265_v61 = vld [vmem:[%s3072_s15 + $0x130] sm:$0xff] }
  0x23   : > { %v309_v60 = vpack.c.bf16 %v264_v58, %v263_v57  ;;  %v266_v62 = vld [vmem:[%s3072_s15 + $0x138] sm:$0xff]  ;;  %v267_v63 = vld [vmem:[%s3072_s15 + $0x140] sm:$0xff]  ;;  %v268_v0 = vld [vmem:[%s3072_s15 + $0x148] sm:$0xff] }
  0x24   : > { %2575 = vmatmul.mubr.msk.bf16.vlgmr.msra.gmra.mxu0 %vm362_vm0, %v292_v11  ;;  %v310_v1 = vpack.c.bf16 %v266_v62, %v265_v61  ;;  %v311_v2 = vpack.c.bf16 %v268_v0, %v267_v63  ;;  %v2779_v3 = vld [vmem:[%s3831_s3 + $0x38] sm:$0xff]   ;;  %v269_v4 = vld [vmem:[%s3072_s15 + $0x150] sm:$0xff]  ;;  %v271_v7 = vld [vmem:[%s3072_s15 + $0x160] sm:$0xff] }
  0x25   : > { %2578 = vmatprep.mubr.msk.bf16.mxu0 %vm362_vm0, %v293_v12  ;;  %2638 = vmatprep.subr.bf16.mxu0 %v2779_v3  ;;  %v270_v5 = vld [vmem:[%s3072_s15 + $0x158] sm:$0xff]  ;;  %v2780_v6 = vld [vmem:[%s3831_s3 + $0x30] sm:$0xff]   ;;  %v272_v8 = vld [vmem:[%s3072_s15 + $0x168] sm:$0xff] }
  0x26   : > { %2718 = vmatprep.subr.bf16.mxu1 %v2779_v3  ;;  %2639 = vmatpush3.bf16.msra.mxu0 %v2779_v3  ;;  %v312_v9 = vpack.c.bf16 %v270_v5, %v269_v4  ;;  %v313_v10 = vpack.c.bf16 %v272_v8, %v271_v7  ;;  %v2781_v11 = vld [vmem:[%s3831_s3 + $0x28] sm:$0xff]   ;;  %v273_v12 = vld [vmem:[%s3072_s15 + $0x170] sm:$0xff]  ;;  %v274_v13 = vld [vmem:[%s3072_s15 + $0x178] sm:$0xff] }
  0x27   : > { %2726 = vmatpush3.bf16.msra.mxu1 %v2779_v3  ;;  %2640 = vmatprep.subr.bf16.mxu0 %v2780_v6  ;;  %v2782_v14 = vld [vmem:[%s3831_s3 + $0x20] sm:$0xff]   ;;  %v276_v16 = vld [vmem:[%s3072_s15 + $0x188] sm:$0xff]  ;;  %v2783_v19 = vld [vmem:[%s3831_s3 + $0x18] sm:$0xff]  }
  0x28   : > { %2719 = vmatprep.subr.bf16.mxu1 %v2780_v6  ;;  %v275_v15 = vld [vmem:[%s3072_s15 + $0x180] sm:$0xff]  ;;  %v277_v20 = vld [vmem:[%s3072_s15 + $0x190] sm:$0xff]  ;;  %v278_v21 = vld [vmem:[%s3072_s15 + $0x198] sm:$0xff] }
  0x29   : > { %v279_v22 = vld [vmem:[%s3072_s15 + $0x1a0] sm:$0xff]  ;;  %v316_v25 = vpack.c.bf16 %v278_v21, %v277_v20  ;;  %v2785_v27 = vld [vmem:[%s3831_s3 + $0x8] sm:$0xff]   ;;  %v281_v28 = vld [vmem:[%s3072_s15 + $0x1b0] sm:$0xff] }
  0x2a   : > { %2641 = vmatpush3.bf16.msra.mxu0 %v2780_v6  ;;  %v284_v31 = vld [vmem:[%s3072_s15 + $0x1c8] sm:$0xff]  ;;  %v2786_v32 = vld [vmem:[%s3831_s3] sm:$0xff]  }
  0x2b   : > { %2727 = vmatpush3.bf16.msra.mxu1 %v2780_v6  ;;  %2642 = vmatprep.subr.bf16.mxu0 %v2781_v11  ;;  %v287_v37 = vld [vmem:[%s3072_s15 + $0x1e0] sm:$0xff]  ;;  %v288_v38 = vld [vmem:[%s3072_s15 + $0x1e8] sm:$0xff] }
  0x2c   : > { %2579 = vmatmul.mubr.msk.bf16.gmra.mxu0 %vm362_vm0, %v294_v17  ;;  %2720 = vmatprep.subr.bf16.mxu1 %v2781_v11  ;;  %v314_v17 = vpack.c.bf16 %v274_v13, %v273_v12  ;;  %v321_v40 = vpack.c.bf16 %v288_v38, %v287_v37  ;;  %v3200_v44 = vld [vmem:[%s3830_s2] ss:$0 sm:$0xff] }
  0x2d   : > { %2582 = vmatprep.mubr.msk.bf16.mxu0 %vm362_vm0, %v295_v18  ;;  %v315_v18 = vpack.c.bf16 %v276_v16, %v275_v15 }
  0x2e   : > { %2643 = vmatpush3.bf16.msra.mxu0 %v2781_v11 }
  0x2f   : > { %2728 = vmatpush3.bf16.msra.mxu1 %v2781_v11  ;;  %2644 = vmatprep.subr.bf16.mxu0 %v2782_v14 }
  0x30   : > { %2721 = vmatprep.subr.bf16.mxu1 %v2782_v14 }
  0x32   : > { %2645 = vmatpush3.bf16.msra.mxu0 %v2782_v14 }
  0x33   : > { %2729 = vmatpush3.bf16.msra.mxu1 %v2782_v14  ;;  %2646 = vmatprep.subr.bf16.mxu0 %v2783_v19 }
  0x34   : > { %2583 = vmatmul.mubr.msk.bf16.gmra.mxu0 %vm362_vm0, %v296_v23  ;;  %2722 = vmatprep.subr.bf16.mxu1 %v2783_v19  ;;  %v280_v23 = vld [vmem:[%s3072_s15 + $0x1a8] sm:$0xff] }
  0x35   : > { %2586 = vmatprep.mubr.msk.bf16.mxu0 %vm362_vm0, %v297_v24  ;;  %v2784_v24 = vld [vmem:[%s3831_s3 + $0x10] sm:$0xff]   ;;  %v317_v26 = vpack.c.bf16 %v280_v23, %v279_v22 }
  0x36   : > { %2647 = vmatpush3.bf16.msra.mxu0 %v2783_v19 }
  0x37   : > { %2730 = vmatpush3.bf16.msra.mxu1 %v2783_v19  ;;  %2648 = vmatprep.subr.bf16.mxu0 %v2784_v24 }
  0x38   : > { %2723 = vmatprep.subr.bf16.mxu1 %v2784_v24 }
  0x3a   : > { %2649 = vmatpush3.bf16.msra.mxu0 %v2784_v24 }
  0x3b   : > { %2731 = vmatpush3.bf16.msra.mxu1 %v2784_v24  ;;  %2650 = vmatprep.subr.bf16.mxu0 %v2785_v27 }
  0x3c   : > { %2587 = vmatmul.mubr.msk.bf16.gmra.mxu0 %vm362_vm0, %v298_v29  ;;  %v282_v29 = vld [vmem:[%s3072_s15 + $0x1b8] sm:$0xff]  ;;  %2724 = vmatprep.subr.bf16.mxu1 %v2785_v27 }
  0x3d   : > { %2590 = vmatprep.mubr.msk.bf16.mxu0 %vm362_vm0, %v299_v30  ;;  %v283_v30 = vld [vmem:[%s3072_s15 + $0x1c0] sm:$0xff]  ;;  %v318_v33 = vpack.c.bf16 %v282_v29, %v281_v28 }
  0x3e   : > { %2651 = vmatpush3.bf16.msra.mxu0 %v2785_v27  ;;  %v319_v34 = vpack.c.bf16 %v284_v31, %v283_v30 }
  0x3f   : > { %2732 = vmatpush3.bf16.msra.mxu1 %v2785_v27  ;;  %2652 = vmatprep.subr.bf16.mxu0 %v2786_v32 }
  0x40   : > { %2725 = vmatprep.subr.bf16.mxu1 %v2786_v32 }
  0x42   : > { %2653 = vmatpush3.bf16.msra.mxu0 %v2786_v32 }
  0x43   : > { %2733 = vmatpush3.bf16.msra.mxu1 %v2786_v32 }
  0x44   : > { %2591 = vmatmul.mubr.msk.bf16.gmra.mxu0 %vm362_vm0, %v300_v35  ;;  %v285_v35 = vld [vmem:[%s3072_s15 + $0x1d0] sm:$0xff] }
  0x45   : > { %2594 = vmatprep.mubr.msk.bf16.mxu0 %vm362_vm0, %v301_v36  ;;  %v286_v36 = vld [vmem:[%s3072_s15 + $0x1d8] sm:$0xff] }
  0x46   : > { %v320_v39 = vpack.c.bf16 %v286_v36, %v285_v35 }
  0x4c   : > { %2595 = vmatmul.mubr.msk.bf16.gmra.mxu0 %vm362_vm0, %v302_v41  ;;  %v289_v41 = vld [vmem:[%s3072_s15 + $0x1f0] sm:$0xff] }
  0x4d   : > { %2598 = vmatprep.mubr.msk.bf16.mxu0 %vm362_vm0, %v303_v42  ;;  %v290_v42 = vld [vmem:[%s3072_s15 + $0x1f8] sm:$0xff] }
  0x4e   : > { %v322_v43 = vpack.c.bf16 %v290_v42, %v289_v41 }
  0x54   : > { %2599 = vmatmul.mubr.msk.bf16.gmra.mxu0 %vm362_vm0, %v304_v47 }
  0x55   : > { %2602 = vmatprep.mubr.msk.bf16.mxu0 %vm362_vm0, %v305_v48 }
  0x5c   : > { %2603 = vmatmul.mubr.msk.bf16.gmra.mxu0 %vm362_vm0, %v306_v53 }
  0x5d   : > { %2606 = vmatprep.mubr.msk.bf16.mxu0 %vm362_vm0, %v307_v54 }
  0x64   : > { %2607 = vmatmul.mubr.msk.bf16.gmra.mxu0 %vm362_vm0, %v308_v59 }
  0x65   : > { %2610 = vmatprep.mubr.msk.bf16.mxu0 %vm362_vm0, %v309_v60 }
  0x6c   : > { %2611 = vmatmul.mubr.msk.bf16.gmra.mxu0 %vm362_vm0, %v310_v1 }
  0x6d   : > { %2614 = vmatprep.mubr.msk.bf16.mxu0 %vm362_vm0, %v311_v2 }
  0x74   : > { %2615 = vmatmul.mubr.msk.bf16.gmra.mxu0 %vm362_vm0, %v312_v9 }
  0x75   : > { %2618 = vmatprep.mubr.msk.bf16.mxu0 %vm362_vm0, %v313_v10 }
  0x7c   : > { %2619 = vmatmul.mubr.msk.bf16.gmra.mxu0 %vm362_vm0, %v314_v17 }
  0x7d   : > { %2622 = vmatprep.mubr.msk.bf16.mxu0 %vm362_vm0, %v315_v18 }
  0x84   : > { %2623 = vmatmul.mubr.msk.bf16.gmra.mxu0 %vm362_vm0, %v316_v25 }
  0x85   : > { %2626 = vmatprep.mubr.msk.bf16.mxu0 %vm362_vm0, %v317_v26 }
  0x8c   : > { %2627 = vmatmul.mubr.msk.bf16.gmra.mxu0 %vm362_vm0, %v318_v33 }
  0x8d   : > { %2630 = vmatprep.mubr.msk.bf16.mxu0 %vm362_vm0, %v319_v34 }
  0x94   : > { %2631 = vmatmul.mubr.msk.bf16.gmra.mxu0 %vm362_vm0, %v320_v39 }
  0x95   : > { %2634 = vmatprep.mubr.msk.bf16.mxu0 %vm362_vm0, %v321_v40 }
  0x9c   : > { %2635 = vmatmul.mubr.msk.bf16.gmra.mxu0 %vm362_vm0, %v322_v43 }
  0xe4   : > { %v2576_v45 = vpop.f32.mrf.mxu0 }
  0xe5   : > { %v3203_v46 = vadd.f32 %v2576_v45, %v3200_v44 }
  0xe6   : > { %v493_v47 = vpop.f32.mrf.mxu0 }
  0xe7   : > { %v750_v48 = vmin.f32 %v3203_v46, 0.0  ;;  %v3207_v49 = vadd.f32 %v3200_v44, %v493_v47 }
  0xe8   : > { %v2577_v50 = vpop.f32.mrf.mxu0 }
  0xe9   : > { %v878_v51 = vmul.f32 10.0, %v750_v48  ;;  %v748_v52 = vmin.f32 %v3207_v49, 0.0  ;;  %v3211_v53 = vadd.f32 %v2577_v50, %v3200_v44 }
  0xea   : > { %v496_v54 = vpop.f32.mrf.mxu0 }
  0xeb   : > { %v944_v55 = vmul.f32 1.442695, %v878_v51  ;;  %v876_v56 = vmul.f32 10.0, %v748_v52  ;;  %v751_v57 = vmin.f32 %v3211_v53, 0.0  ;;  %v3215_v58 = vadd.f32 %v3200_v44, %v496_v54 }
  0xec   : > { %v2580_v59 = vpop.f32.mrf.mxu0  ;;  %v815_v41 = vmax.f32 %v3211_v53, 0.0 }
  0xed   : > { %v940_v60 = vmul.f32 1.442695, %v876_v56  ;;  %v879_v61 = vmul.f32 10.0, %v751_v57  ;;  %v3218_v62 = vadd.f32 %v2580_v59, %v3200_v44  ;;  %v749_v63 = vmin.f32 %v3215_v58, 0.0 }
  0xee   : > { %v509_v0 = vpop.f32.mrf.mxu0  ;;  %2787 = vpow2.f32 %v944_v55  ;;  %v813_v59 = vmax.f32 %v3215_v58, 0.0  ;;  %v814_v58 = vmax.f32 %v3203_v46, 0.0 }
  0xef   : > { %v946_v1 = vmul.f32 1.442695, %v879_v61  ;;  %v754_v2 = vmin.f32 %v3218_v62, 0.0  ;;  %2789 = vpow2.f32 %v940_v60  ;;  %v877_v3 = vmul.f32 10.0, %v749_v63 }
  0xf0   : > { %v2581_v4 = vpop.f32.mrf.mxu0  ;;  %v3226_v9 = vadd.f32 %v3200_v44, %v509_v0 }
  0xf1   : > { %2791 = vpow2.f32 %v946_v1  ;;  %v3223_v5 = vadd.f32 %v2581_v4, %v3200_v44  ;;  %v942_v6 = vmul.f32 1.442695, %v877_v3  ;;  %v882_v8 = vmul.f32 10.0, %v754_v2 }
  0xf2   : > { %v512_v7 = vpop.f32.mrf.mxu0  ;;  %v752_v17 = vmin.f32 %v3226_v9, 0.0 }
  0xf3   : > { %v755_v10 = vmin.f32 %v3223_v5, 0.0  ;;  %2793 = vpow2.f32 %v942_v6  ;;  %v3230_v11 = vadd.f32 %v3200_v44, %v512_v7  ;;  %v952_v16 = vmul.f32 1.442695, %v882_v8 }
  0xf4   : > { %v2584_v12 = vpop.f32.mrf.mxu0  ;;  %v880_v27 = vmul.f32 10.0, %v752_v17 }
  0xf5   : > { %v883_v13 = vmul.f32 10.0, %v755_v10  ;;  %v3233_v14 = vadd.f32 %v2584_v12, %v3200_v44  ;;  %v753_v19 = vmin.f32 %v3230_v11, 0.0  ;;  %2795 = vpow2.f32 %v952_v16 }
  0xf6   : > { %v525_v15 = vpop.f32.mrf.mxu0  ;;  %v948_v43 = vmul.f32 1.442695, %v880_v27  ;;  %v812_v12 = vmax.f32 %v3207_v49, 0.0 }
  0xf7   : > { %v3237_v18 = vadd.f32 %v3200_v44, %v525_v15  ;;  %v758_v20 = vmin.f32 %v3233_v14, 0.0  ;;  %v954_v23 = vmul.f32 1.442695, %v883_v13  ;;  %v881_v30 = vmul.f32 10.0, %v753_v19 }
  0xf8   : > { %v2585_v21 = vpop.f32.mrf.mxu0 }
  0xf9   : > { %v756_v22 = vmin.f32 %v3237_v18, 0.0  ;;  %v886_v24 = vmul.f32 10.0, %v758_v20  ;;  %v3243_v25 = vadd.f32 %v2585_v21, %v3200_v44  ;;  %2797 = vpow2.f32 %v954_v23 }
  0xfa   : > { %v528_v26 = vpop.f32.mrf.mxu0  ;;  %v950_v47 = vmul.f32 1.442695, %v881_v30  ;;  %v818_v30 = vmax.f32 %v3218_v62, 0.0  ;;  %v819_v62 = vmax.f32 %v3223_v5, 0.0 }
  0xfb   : > { %v3246_v28 = vadd.f32 %v3200_v44, %v528_v26  ;;  %v2788_v29 = vpop.eup %2787  ;;  %v759_v31 = vmin.f32 %v3243_v25, 0.0  ;;  %v884_v34 = vmul.f32 10.0, %v756_v22  ;;  %v960_v37 = vmul.f32 1.442695, %v886_v24 }
  0xfc   : > { %v2588_v32 = vpop.f32.mrf.mxu0  ;;  %v2790_v33 = vpop.eup %2789  ;;  %v2094_v45 = vadd.f32 -1.0, %v2788_v29 }
  0xfd   : > { %v757_v35 = vmin.f32 %v3246_v28, 0.0  ;;  %v887_v38 = vmul.f32 10.0, %v759_v31  ;;  %v3251_v39 = vadd.f32 %v2588_v32, %v3200_v44  ;;  %v2092_v54 = vadd.f32 -1.0, %v2790_v33 }
  0xfe   : > { %v2792_v36 = vpop.eup %2791  ;;  %v541_v40 = vpop.f32.mrf.mxu0  ;;  %v956_v55 = vmul.f32 1.442695, %v884_v34  ;;  %2799 = vpow2.f32 %v960_v37  ;;  %v1134_v7 = vmul.f32 0.1, %v2094_v45  ;;  %v816_v31 = vmax.f32 %v3226_v9, 0.0 }
  0xff   : > { %v2095_v42 = vadd.f32 -1.0, %v2792_v36  ;;  %v885_v48 = vmul.f32 10.0, %v757_v35  ;;  %v762_v50 = vmin.f32 %v3251_v39, 0.0  ;;  %v3256_v56 = vadd.f32 %v3200_v44, %v541_v40 }
 0x100   : > { %v2589_v51 = vpop.f32.mrf.mxu0  ;;  %v2794_v52 = vpop.eup %2793  ;;  %v962_v60 = vmul.f32 1.442695, %v887_v38  ;;  %2801 = vpow2.f32 %v948_v43  ;;  %v1132_v8 = vmul.f32 0.1, %v2092_v54  ;;  %v1198_v24 = vadd.f32 %v1134_v7, %v814_v58 }
 0x101   : > { %v3259_v57 = vadd.f32 %v2589_v51, %v3200_v44  ;;  %v2093_v53 = vadd.f32 -1.0, %v2794_v52  ;;  %v1135_v63 = vmul.f32 0.1, %v2095_v42  ;;  %v958_v0 = vmul.f32 1.442695, %v885_v48 }
 0x102   : > { %v544_v61 = vpop.f32.mrf.mxu0  ;;  %v760_v1 = vmin.f32 %v3256_v56, 0.0  ;;  %2803 = vpow2.f32 %v950_v47  ;;  %v890_v3 = vmul.f32 10.0, %v762_v50  ;;  %v2796_v20 = vpop.eup %2795  ;;  %v1196_v26 = vadd.f32 %v1132_v8, %v812_v12 }
 0x103   : > { %v1133_v2 = vmul.f32 0.1, %v2093_v53  ;;  %v763_v4 = vmin.f32 %v3259_v57, 0.0  ;;  %2805 = vpow2.f32 %v956_v55  ;;  %v3267_v13 = vadd.f32 %v3200_v44, %v544_v61 }
 0x104   : > { %v2592_v6 = vpop.f32.mrf.mxu0  ;;  %v888_v10 = vmul.f32 10.0, %v760_v1  ;;  %2807 = vpow2.f32 %v962_v60  ;;  %v1199_v16 = vadd.f32 %v1135_v63, %v815_v41  ;;  %v968_v21 = vmul.f32 1.442695, %v890_v3 }
 0x105   : > { %v1197_v17 = vadd.f32 %v1133_v2, %v813_v59  ;;  %2809 = vpow2.f32 %v958_v0  ;;  %v3270_v19 = vadd.f32 %v2592_v6, %v3200_v44  ;;  %v891_v22 = vmul.f32 10.0, %v763_v4 }
 0x106   : > { %v557_v15 = vpop.f32.mrf.mxu0  ;;  %v761_v23 = vmin.f32 %v3267_v13, 0.0  ;;  %v964_v27 = vmul.f32 1.442695, %v888_v10  ;;  %v2798_v34 = vpop.eup %2797  ;;  %v1261_v35 = vpack.c.bf16 %v1199_v16, %v1198_v24  ;;  %v2098_v36 = vadd.f32 -1.0, %v2796_v20 }
 0x107   : > { %v3274_v46 = vadd.f32 %v3200_v44, %v557_v15  ;;  %v766_v29 = vmin.f32 %v3270_v19, 0.0  ;;  %v1260_v38 = vpack.c.bf16 %v1197_v17, %v1196_v26  ;;  %2811 = vpow2.f32 %v968_v21 }
 0x108   : > { %v2593_v49 = vpop.f32.mrf.mxu0  ;;  %v889_v32 = vmul.f32 10.0, %v761_v23  ;;  %v970_v40 = vmul.f32 1.442695, %v891_v22  ;;  %2813 = vpow2.f32 %v964_v27  ;;  %v2099_v48 = vadd.f32 -1.0, %v2798_v34 }
 0x109   : > { %v764_v37 = vmin.f32 %v3274_v46, 0.0  ;;  %v3281_v41 = vadd.f32 %v2593_v49, %v3200_v44  ;;  %v894_v47 = vmul.f32 10.0, %v766_v29  ;;  %2654 = vmatprep.mubr.bf16.mxu0 %v1260_v38  ;;  %v817_v50 = vmax.f32 %v3230_v11, 0.0 }
 0x10a   : > { %v560_v33 = vpop.f32.mrf.mxu0  ;;  %v966_v45 = vmul.f32 1.442695, %v889_v32  ;;  %v822_v51 = vmax.f32 %v3233_v14, 0.0  ;;  %2655 = vmatmul.mubr.bf16.vlgmr.msra.gmra.mxu0 %v1261_v35  ;;  %v1138_v59 = vmul.f32 0.1, %v2098_v36  ;;  %v820_v53 = vmax.f32 %v3237_v18, 0.0 }
 0x10b   : > { %v3284_v42 = vadd.f32 %v3200_v44, %v560_v33  ;;  %v2800_v55 = vpop.eup %2799  ;;  %v823_v60 = vmax.f32 %v3243_v25, 0.0  ;;  %v892_v5 = vmul.f32 10.0, %v764_v37  ;;  %v821_v63 = vmax.f32 %v3246_v28, 0.0 }
 0x10c   : > { %v2596_v43 = vpop.f32.mrf.mxu0  ;;  %v826_v0 = vmax.f32 %v3251_v39, 0.0  ;;  %2815 = vpow2.f32 %v970_v40  ;;  %v767_v1 = vmin.f32 %v3281_v41, 0.0  ;;  %v976_v3 = vmul.f32 1.442695, %v894_v47 }
 0x10d   : > { %v765_v52 = vmin.f32 %v3284_v42, 0.0  ;;  %v2802_v61 = vpop.eup %2801  ;;  %2817 = vpow2.f32 %v966_v45  ;;  %v1139_v8 = vmul.f32 0.1, %v2099_v48  ;;  %v2102_v10 = vadd.f32 -1.0, %v2800_v55 }
 0x10e   : > { %v573_v54 = vpop.f32.mrf.mxu0  ;;  %v824_v58 = vmax.f32 %v3256_v56, 0.0  ;;  %v3300_v12 = vadd.f32 %v2596_v43, %v3200_v44  ;;  %v3302_v17 = vadd.f32 %v1138_v59, %v818_v30  ;;  %v827_v20 = vmax.f32 %v3259_v57, 0.0 }
 0x10f   : > { %v2804_v2 = vpop.eup %2803  ;;  %v893_v4 = vmul.f32 10.0, %v765_v52  ;;  %v3296_v6 = vadd.f32 %v3200_v44, %v573_v54  ;;  %v972_v21 = vmul.f32 1.442695, %v892_v5  ;;  %v825_v49 = vmax.f32 %v3267_v13, 0.0 }
 0x110   : > { %v2597_v14 = vpop.f32.mrf.mxu0  ;;  %v2806_v7 = vpop.eup %2805  ;;  %v830_v24 = vmax.f32 %v3270_v19, 0.0  ;;  %v895_v26 = vmul.f32 10.0, %v767_v1  ;;  %2819 = vpow2.f32 %v976_v3  ;;  %v828_v30 = vmax.f32 %v3274_v46, 0.0 }
 0x111   : > { %v2808_v16 = vpop.eup %2807  ;;  %v3306_v22 = vadd.f32 %v2597_v14, %v3200_v44  ;;  %v768_v27 = vmin.f32 %v3296_v6, 0.0  ;;  %v2100_v32 = vadd.f32 -1.0, %v2806_v7  ;;  %v974_v33 = vmul.f32 1.442695, %v893_v4 }
 0x112   : > { %v576_v15 = vpop.f32.mrf.mxu0  ;;  %v2810_v23 = vpop.eup %2809  ;;  %v1203_v34 = vadd.f32 %v1139_v8, %v819_v62  ;;  %v1142_v35 = vmul.f32 0.1, %v2102_v10  ;;  %v770_v36 = vmin.f32 %v3300_v12, 0.0  ;;  %v2096_v37 = vadd.f32 -1.0, %v2802_v61 }
 0x113   : > { %v2103_v40 = vadd.f32 -1.0, %v2808_v16  ;;  %v2101_v43 = vadd.f32 -1.0, %v2810_v23  ;;  %2821 = vpow2.f32 %v972_v21  ;;  %v771_v45 = vmin.f32 %v3306_v22, 0.0 }
 0x114   : > { %v2600_v29 = vpop.f32.mrf.mxu0  ;;  %v978_v47 = vmul.f32 1.442695, %v895_v26  ;;  %v896_v48 = vmul.f32 10.0, %v768_v27  ;;  %v2097_v52 = vadd.f32 -1.0, %v2804_v2  ;;  %v1136_v54 = vmul.f32 0.1, %v2096_v37  ;;  %v2812_v59 = vpop.eup %2811 }
 0x115   : > { %v1140_v5 = vmul.f32 0.1, %v2100_v32  ;;  %v831_v1 = vmax.f32 %v3281_v41, 0.0  ;;  %2823 = vpow2.f32 %v974_v33  ;;  %v3316_v62 = vadd.f32 %v3200_v44, %v576_v15  ;;  %v2814_v61 = vpop.eup %2813 }
 0x116   : > { %v589_v38 = vpop.f32.mrf.mxu0  ;;  %v3318_v14 = vadd.f32 %v1142_v35, %v822_v51  ;;  %v829_v3 = vmax.f32 %v3284_v42, 0.0  ;;  %v898_v4 = vmul.f32 10.0, %v770_v36  ;;  %v1137_v7 = vmul.f32 0.1, %v2097_v52 }
 0x117   : > { %v1143_v10 = vmul.f32 0.1, %v2103_v40  ;;  %v1141_v2 = vmul.f32 0.1, %v2101_v43  ;;  %v899_v16 = vmul.f32 10.0, %v771_v45  ;;  %v769_v21 = vmin.f32 %v3316_v62, 0.0 }
 0x118   : > { %v2601_v55 = vpop.f32.mrf.mxu0  ;;  %2825 = vpow2.f32 %v978_v47  ;;  %v980_v23 = vmul.f32 1.442695, %v896_v48  ;;  %v1200_v26 = vadd.f32 %v1136_v54, %v816_v31  ;;  %v1201_v15 = vadd.f32 %v1137_v7, %v817_v50 }
 0x119   : > { %v2816_v27 = vpop.eup %2815  ;;  %v2106_v32 = vadd.f32 -1.0, %v2812_v59  ;;  %v2104_v33 = vadd.f32 -1.0, %v2814_v61  ;;  %v897_v35 = vmul.f32 10.0, %v769_v21  ;;  %v3327_v36 = vadd.f32 %v3200_v44, %v589_v38 }
 0x11a   : > { %v592_v8 = vpop.f32.mrf.mxu0  ;;  %v2818_v37 = vpop.eup %2817  ;;  %v984_v40 = vmul.f32 1.442695, %v898_v4  ;;  %v1262_v43 = vpack.c.bf16 %v1201_v15, %v1200_v26  ;;  %v3330_v45 = vadd.f32 %v2600_v29, %v3200_v44  ;;  %v3333_v9 = vadd.f32 %v2601_v55, %v3200_v44 }
 0x11b   : > { %v1205_v11 = vadd.f32 %v1141_v2, %v821_v63  ;;  %v986_v50 = vmul.f32 1.442695, %v899_v16  ;;  %v982_v47 = vmul.f32 1.442695, %v897_v35  ;;  %v1263_v48 = vpack.c.bf16 %v1203_v34, %v3302_v17 }
 0x11c   : > { %v2604_v51 = vpop.f32.mrf.mxu0  ;;  %v1204_v38 = vadd.f32 %v1140_v5, %v820_v53  ;;  %v834_v52 = vmax.f32 %v3300_v12, 0.0  ;;  %2827 = vpow2.f32 %v980_v23  ;;  %2658 = vmatprep.mubr.bf16.mxu1 %v1262_v43  ;;  %v772_v29 = vmin.f32 %v3327_v36, 0.0 }
 0x11d   : > { %v1146_v55 = vmul.f32 0.1, %v2106_v32  ;;  %v2107_v59 = vadd.f32 -1.0, %v2816_v27  ;;  %v2105_v61 = vadd.f32 -1.0, %v2818_v37  ;;  %2829 = vpow2.f32 %v982_v47  ;;  %2659 = vmatmul.mubr.bf16.vlgmr.msra.gmra.mxu1 %v1263_v48  ;;  %v2820_v28 = vpop.eup %2819 }
 0x11e   : > { %v605_v31 = vpop.f32.mrf.mxu0  ;;  %v1144_v63 = vmul.f32 0.1, %v2104_v33  ;;  %2831 = vpow2.f32 %v984_v40  ;;  %v774_v17 = vmin.f32 %v3330_v45, 0.0  ;;  %v775_v18 = vmin.f32 %v3333_v9, 0.0 }
 0x11f   : > { %v1207_v34 = vadd.f32 %v1143_v10, %v823_v60  ;;  %2833 = vpow2.f32 %v986_v50  ;;  %v900_v5 = vmul.f32 10.0, %v772_v29  ;;  %v1264_v4 = vpack.c.bf16 %v1205_v11, %v1204_v38 }
 0x120   : > { %v2605_v54 = vpop.f32.mrf.mxu0  ;;  %v2822_v7 = vpop.eup %2821  ;;  %v832_v2 = vmax.f32 %v3296_v6, 0.0  ;;  %v835_v16 = vmax.f32 %v3306_v22, 0.0  ;;  %v903_v21 = vmul.f32 10.0, %v775_v18  ;;  %v3349_v23 = vadd.f32 %v3200_v44, %v592_v8 }
 0x121   : > { %v3355_v15 = vadd.f32 %v1146_v55, %v826_v0  ;;  %v1145_v25 = vmul.f32 0.1, %v2105_v61  ;;  %v2110_v60 = vadd.f32 -1.0, %v2820_v28  ;;  %2662 = vmatprep.mubr.bf16.mxu1 %v1264_v4  ;;  %v3358_v10 = vadd.f32 %v2604_v51, %v3200_v44 }
 0x122   : > { %v608_v53 = vpop.f32.mrf.mxu0  ;;  %v2824_v27 = vpop.eup %2823  ;;  %v1208_v32 = vadd.f32 %v1144_v63, %v824_v58  ;;  %v1147_v33 = vmul.f32 0.1, %v2107_v59  ;;  %v902_v35 = vmul.f32 10.0, %v774_v17  ;;  %v773_v8 = vmin.f32 %v3349_v23, 0.0 }
 0x123   : > { %v2108_v40 = vadd.f32 -1.0, %v2822_v7  ;;  %v833_v39 = vmax.f32 %v3316_v62, 0.0  ;;  %v988_v0 = vmul.f32 1.442695, %v900_v5  ;;  %v1265_v43 = vpack.c.bf16 %v1207_v34, %v3318_v14 }
 0x124   : > { %v3351_v26 = vpop.f32.mrf.mxu0  ;;  %v994_v11 = vmul.f32 1.442695, %v903_v21  ;;  %v901_v50 = vmul.f32 10.0, %v773_v8  ;;  %v778_v51 = vmin.f32 %v3358_v10, 0.0  ;;  %v3367_v47 = vadd.f32 %v3200_v44, %v605_v31 }
 0x125   : > { %v2826_v58 = vpop.eup %2825  ;;  %v1209_v48 = vadd.f32 %v1145_v25, %v825_v49  ;;  %v1150_v38 = vmul.f32 0.1, %v2110_v60  ;;  %v2109_v29 = vadd.f32 -1.0, %v2824_v27  ;;  %2663 = vmatmul.mubr.bf16.gmra.mxu1 %v1265_v43  ;;  %v3372_v55 = vadd.f32 %v2605_v54, %v3200_v44 }
 0x126   : > { %v621_v37 = vpop.f32.mrf.mxu0  ;;  %v1211_v14 = vadd.f32 %v1147_v33, %v827_v20  ;;  %v992_v59 = vmul.f32 1.442695, %v902_v35  ;;  %v990_v61 = vmul.f32 1.442695, %v901_v50  ;;  %v776_v28 = vmin.f32 %v3367_v47, 0.0 }
 0x127   : > { %v1148_v63 = vmul.f32 0.1, %v2108_v40  ;;  %v838_v17 = vmax.f32 %v3330_v45, 0.0  ;;  %2835 = vpow2.f32 %v988_v0  ;;  %v779_v13 = vmin.f32 %v3372_v55, 0.0 }
 0x128   : > { %v2609_v56 = vpop.f32.mrf.mxu0  ;;  %v2111_v49 = vadd.f32 -1.0, %v2826_v58  ;;  %2837 = vpow2.f32 %v994_v11  ;;  %v906_v18 = vmul.f32 10.0, %v778_v51  ;;  %v904_v34 = vmul.f32 10.0, %v776_v28 }
 0x129   : > { %v2828_v5 = vpop.eup %2827  ;;  %v1149_v57 = vmul.f32 0.1, %v2109_v29  ;;  %2839 = vpow2.f32 %v990_v61  ;;  %v907_v20 = vmul.f32 10.0, %v779_v13  ;;  %v1266_v4 = vpack.c.bf16 %v1209_v48, %v1208_v32 }
 0x12a   : > { %v624_v31 = vpop.f32.mrf.mxu0  ;;  %v2830_v7 = vpop.eup %2829  ;;  %2841 = vpow2.f32 %v992_v59  ;;  %v836_v21 = vmax.f32 %v3327_v36, 0.0  ;;  %v996_v25 = vmul.f32 1.442695, %v904_v34  ;;  %v3383_v60 = vadd.f32 %v3200_v44, %v608_v53 }
 0x12b   : > { %v2832_v33 = vpop.eup %2831  ;;  %v2113_v35 = vadd.f32 -1.0, %v2830_v7  ;;  %2666 = vmatprep.mubr.bf16.mxu1 %v1266_v4  ;;  %v1267_v8 = vpack.c.bf16 %v1211_v14, %v3355_v15  ;;  %v3387_v40 = vadd.f32 %v3200_v44, %v621_v37  ;;  %v3390_v0 = vadd.f32 %v2609_v56, %v3200_v44 }
 0x12c   : > { %v3379_v54 = vpop.f32.mrf.mxu0  ;;  %v2834_v32 = vpop.eup %2833  ;;  %v1151_v43 = vmul.f32 0.1, %v2111_v49  ;;  %v2112_v11 = vadd.f32 -1.0, %v2828_v5  ;;  %v1000_v50 = vmul.f32 1.442695, %v906_v18  ;;  %v777_v51 = vmin.f32 %v3383_v60, 0.0 }
 0x12d   : > { %v1214_v58 = vadd.f32 %v1150_v38, %v830_v24  ;;  %v1213_v48 = vadd.f32 %v1149_v57, %v829_v3  ;;  %v1002_v15 = vmul.f32 1.442695, %v907_v20  ;;  %2667 = vmatmul.mubr.bf16.gmra.mxu1 %v1267_v8  ;;  %v3399_v37 = vadd.f32 %v3351_v26, %v3200_v44 }
 0x12e   : > { %v637_v27 = vpop.f32.mrf.mxu0  ;;  %v2114_v56 = vadd.f32 -1.0, %v2832_v33  ;;  %v1153_v29 = vmul.f32 0.1, %v2113_v35  ;;  %v905_v14 = vmul.f32 10.0, %v777_v51  ;;  %v780_v59 = vmin.f32 %v3387_v40, 0.0 }
 0x12f   : > { %v1212_v19 = vadd.f32 %v1148_v63, %v828_v30  ;;  %v2115_v24 = vadd.f32 -1.0, %v2834_v32  ;;  %2843 = vpow2.f32 %v996_v25  ;;  %v783_v42 = vmin.f32 %v3390_v0, 0.0 }
 0x130   : > { %v2613_v53 = vpop.f32.mrf.mxu0  ;;  %v1215_v3 = vadd.f32 %v1151_v43, %v831_v1  ;;  %v1152_v38 = vmul.f32 0.1, %v2112_v11  ;;  %2845 = vpow2.f32 %v1000_v50  ;;  %v998_v26 = vmul.f32 1.442695, %v905_v14 }
 0x131   : > { %2847 = vpow2.f32 %v1002_v15  ;;  %v782_v13 = vmin.f32 %v3399_v37, 0.0  ;;  %v1268_v49 = vpack.c.bf16 %v1213_v48, %v1212_v19  ;;  %v3413_v18 = vadd.f32 %v3200_v44, %v624_v31 }
 0x132   : > { %v3402_v61 = vpop.f32.mrf.mxu0  ;;  %v1154_v46 = vmul.f32 0.1, %v2114_v56  ;;  %v1217_v30 = vadd.f32 %v1153_v29, %v833_v39  ;;  %2849 = vpow2.f32 %v998_v26  ;;  %v908_v63 = vmul.f32 10.0, %v780_v59 }
 0x133   : > { %v1155_v1 = vmul.f32 0.1, %v2115_v24  ;;  %v839_v34 = vmax.f32 %v3333_v9, 0.0  ;;  %v911_v5 = vmul.f32 10.0, %v783_v42  ;;  %2670 = vmatprep.mubr.bf16.mxu1 %v1268_v49  ;;  %v781_v57 = vmin.f32 %v3413_v18, 0.0 }
 0x134   : > { %v3409_v28 = vpop.f32.mrf.mxu0  ;;  %v2836_v20 = vpop.eup %2835  ;;  %v1216_v31 = vadd.f32 %v1152_v38, %v832_v2  ;;  %v837_v4 = vmax.f32 %v3349_v23, 0.0  ;;  %v842_v62 = vmax.f32 %v3358_v10, 0.0  ;;  %v1269_v39 = vpack.c.bf16 %v1215_v3, %v1214_v58 }
 0x135   : > { %v2838_v25 = vpop.eup %2837  ;;  %v840_v33 = vmax.f32 %v3367_v47, 0.0  ;;  %v910_v35 = vmul.f32 10.0, %v782_v13  ;;  %v909_v8 = vmul.f32 10.0, %v781_v57  ;;  %v3427_v32 = vadd.f32 %v3200_v44, %v637_v27 }
 0x136   : > { %v3417_v41 = vpop.f32.mrf.mxu0  ;;  %v2840_v43 = vpop.eup %2839  ;;  %v1218_v11 = vadd.f32 %v1154_v46, %v834_v52  ;;  %v1004_v6 = vmul.f32 1.442695, %v908_v63  ;;  %2671 = vmatmul.mubr.bf16.gmra.mxu1 %v1269_v39  ;;  %v3432_v2 = vadd.f32 %v2613_v53, %v3200_v44  ;;  %v1270_v50 = vpack.c.bf16 %v1217_v30, %v1216_v31 }
 0x137   : > { %v2842_v58 = vpop.eup %2841  ;;  %v1219_v48 = vadd.f32 %v1155_v1, %v835_v16  ;;  %v1010_v15 = vmul.f32 1.442695, %v911_v5  ;;  %v1006_v56 = vmul.f32 1.442695, %v909_v8  ;;  %v3440_v27 = vadd.f32 %v3379_v54, %v3200_v44 }
 0x138   : > { %v2617_v7 = vpop.f32.mrf.mxu0  ;;  %v2116_v12 = vadd.f32 -1.0, %v2836_v20  ;;  %v2119_v52 = vadd.f32 -1.0, %v2838_v25  ;;  %v784_v29 = vmin.f32 %v3427_v32, 0.0  ;;  %v787_v53 = vmin.f32 %v3432_v2, 0.0  ;;  %2674 = vmatprep.mubr.bf16.mxu1 %v1270_v50 }
 0x139   : > { %v2117_v59 = vadd.f32 -1.0, %v2840_v43  ;;  %v843_v19 = vmax.f32 %v3372_v55, 0.0  ;;  %v1008_v22 = vmul.f32 1.442695, %v910_v35  ;;  %2851 = vpow2.f32 %v1006_v56 }
 0x13a   : > { %v3434_v51 = vpop.f32.mrf.mxu0  ;;  %v2118_v16 = vadd.f32 -1.0, %v2842_v58  ;;  %v841_v24 = vmax.f32 %v3383_v60, 0.0  ;;  %2853 = vpow2.f32 %v1004_v6  ;;  %v912_v54 = vmul.f32 10.0, %v784_v29 }
 0x13b   : > { %v846_v3 = vmax.f32 %v3399_v37, 0.0  ;;  %2855 = vpow2.f32 %v1010_v15  ;;  %v786_v38 = vmin.f32 %v3440_v27, 0.0  ;;  %v3454_v26 = vadd.f32 %v3200_v44, %v3402_v61 }
 0x13c   : > { %v3444_v14 = vpop.f32.mrf.mxu0  ;;  %v2844_v13 = vpop.eup %2843  ;;  %v1156_v49 = vmul.f32 0.1, %v2116_v12  ;;  %v1159_v46 = vmul.f32 0.1, %v2119_v52  ;;  %v915_v30 = vmul.f32 10.0, %v787_v53  ;;  %v1271_v63 = vpack.c.bf16 %v1219_v48, %v1218_v11 }
 0x13d   : > { %v2846_v60 = vpop.eup %2845  ;;  %v1157_v5 = vmul.f32 0.1, %v2117_v59  ;;  %2857 = vpow2.f32 %v1008_v22  ;;  %v844_v57 = vmax.f32 %v3387_v40, 0.0  ;;  %v785_v20 = vmin.f32 %v3454_v26, 0.0 }
 0x13e   : > { %v3448_v42 = vpop.f32.mrf.mxu0  ;;  %v2848_v31 = vpop.eup %2847  ;;  %v1158_v39 = vmul.f32 0.1, %v2118_v16  ;;  %v1012_v25 = vmul.f32 1.442695, %v912_v54  ;;  %2675 = vmatmul.mubr.bf16.gmra.mxu1 %v1271_v63  ;;  %v3462_v61 = vadd.f32 %v3409_v28, %v3200_v44  ;;  %v3466_v35 = vadd.f32 %v3200_v44, %v3417_v41 }
 0x13f   : > { %v2850_v43 = vpop.eup %2849  ;;  %v2120_v11 = vadd.f32 -1.0, %v2844_v13  ;;  %v914_v6 = vmul.f32 10.0, %v786_v38  ;;  %v913_v50 = vmul.f32 10.0, %v785_v20  ;;  %v3471_v58 = vadd.f32 %v2617_v7, %v3200_v44 }
 0x140   : > { %v3456_v1 = vpop.f32.mrf.mxu0  ;;  %v1220_v48 = vadd.f32 %v1156_v49, %v836_v21  ;;  %v1223_v28 = vadd.f32 %v1159_v46, %v839_v34  ;;  %v2121_v15 = vadd.f32 -1.0, %v2850_v43  ;;  %v1018_v56 = vmul.f32 1.442695, %v915_v30 }
 0x141   : > { %v1221_v41 = vadd.f32 %v1157_v5, %v837_v4  ;;  %v2122_v52 = vadd.f32 -1.0, %v2846_v60  ;;  %v1014_v29 = vmul.f32 1.442695, %v913_v50  ;;  %v790_v53 = vmin.f32 %v3462_v61, 0.0 }
 0x142   : > { %v3468_v8 = vpop.f32.mrf.mxu0  ;;  %v2123_v59 = vadd.f32 -1.0, %v2848_v31  ;;  %v1161_v7 = vmul.f32 0.1, %v2121_v15  ;;  %2859 = vpow2.f32 %v1012_v25  ;;  %v788_v36 = vmin.f32 %v3466_v35, 0.0 }
 0x143   : > { %v1160_v9 = vmul.f32 0.1, %v2120_v11  ;;  %v1016_v34 = vmul.f32 1.442695, %v914_v6  ;;  %2861 = vpow2.f32 %v1014_v29  ;;  %v791_v22 = vmin.f32 %v3471_v58, 0.0 }
 0x144   : > { %v3477_v12 = vpop.f32.mrf.mxu0  ;;  %v1222_v23 = vadd.f32 %v1158_v39, %v838_v17  ;;  %v847_v4 = vmax.f32 %v3390_v0, 0.0  ;;  %v845_v16 = vmax.f32 %v3413_v18, 0.0  ;;  %2863 = vpow2.f32 %v1018_v56 }
 0x145   : > { %v1225_v38 = vadd.f32 %v1161_v7, %v841_v24  ;;  %v850_v13 = vmax.f32 %v3440_v27, 0.0  ;;  %v918_v49 = vmul.f32 10.0, %v790_v53  ;;  %v1272_v46 = vpack.c.bf16 %v1221_v41, %v1220_v48 }
 0x146   : > { %v3483_v21 = vpop.f32.mrf.mxu0  ;;  %v2852_v30 = vpop.eup %2851  ;;  %v1162_v63 = vmul.f32 0.1, %v2122_v52  ;;  %v916_v60 = vmul.f32 10.0, %v788_v36  ;;  %v3495_v5 = vadd.f32 %v3200_v44, %v3434_v51  ;;  %v1273_v45 = vpack.c.bf16 %v1223_v28, %v1222_v23 }
 0x147   : > { %v2854_v20 = vpop.eup %2853  ;;  %v1224_v18 = vadd.f32 %v1160_v9, %v840_v33  ;;  %v1163_v31 = vmul.f32 0.1, %v2123_v59  ;;  %2865 = vpow2.f32 %v1016_v34  ;;  %v919_v24 = vmul.f32 10.0, %v791_v22  ;;  %2678 = vmatprep.mubr.bf16.mxu1 %v1272_v46 }
 0x148   : > { %v3490_v54 = vpop.f32.mrf.mxu0  ;;  %v2856_v39 = vpop.eup %2855  ;;  %v2125_v25 = vadd.f32 -1.0, %v2852_v30  ;;  %v789_v43 = vmin.f32 %v3495_v5, 0.0  ;;  %2679 = vmatmul.mubr.bf16.gmra.mxu1 %v1273_v45  ;;  %v3504_v51 = vadd.f32 %v3444_v14, %v3200_v44  ;;  %v3508_v11 = vadd.f32 %v3200_v44, %v3448_v42 }
 0x149   : > { %v848_v47 = vmax.f32 %v3427_v32, 0.0  ;;  %v1024_v33 = vmul.f32 1.442695, %v918_v49  ;;  %v3515_v50 = vadd.f32 %v3456_v1, %v3200_v44  ;;  %v1274_v48 = vpack.c.bf16 %v1225_v38, %v1224_v18 }
 0x14a   : > { %v3497_v17 = vpop.f32.mrf.mxu0  ;;  %v2858_v28 = vpop.eup %2857  ;;  %v2124_v15 = vadd.f32 -1.0, %v2854_v20  ;;  %v1020_v56 = vmul.f32 1.442695, %v916_v60  ;;  %v917_v41 = vmul.f32 10.0, %v789_v43  ;;  %v792_v14 = vmin.f32 %v3508_v11, 0.0 }
 0x14b   : > { %v1226_v42 = vadd.f32 %v1162_v63, %v842_v62  ;;  %v2127_v29 = vadd.f32 -1.0, %v2856_v39  ;;  %v851_v53 = vmax.f32 %v3432_v2, 0.0  ;;  %v1026_v59 = vmul.f32 1.442695, %v919_v24  ;;  %2682 = vmatprep.mubr.bf16.mxu1 %v1274_v48 }
 0x14c   : > { %v3510_v6 = vpop.f32.mrf.mxu0  ;;  %v1227_v1 = vadd.f32 %v1163_v31, %v843_v19  ;;  %v1165_v7 = vmul.f32 0.1, %v2125_v25  ;;  %v1022_v36 = vmul.f32 1.442695, %v917_v41  ;;  %v794_v9 = vmin.f32 %v3504_v51, 0.0 }
 0x14d   : > { %v2126_v34 = vadd.f32 -1.0, %v2858_v28  ;;  %v849_v22 = vmax.f32 %v3454_v26, 0.0  ;;  %2867 = vpow2.f32 %v1024_v33  ;;  %v795_v23 = vmin.f32 %v3515_v50, 0.0 }
 0x14e   : > { %v3518_v52 = vpop.f32.mrf.mxu0  ;;  %v1164_v62 = vmul.f32 0.1, %v2124_v15  ;;  %v854_v38 = vmax.f32 %v3462_v61, 0.0  ;;  %2869 = vpow2.f32 %v1020_v56  ;;  %v920_v49 = vmul.f32 10.0, %v792_v14  ;;  %v3551_v56 = vld [vmem:[%s3830_s2] ss:$0 sm:$0xff] }
 0x14f   : > { %v2860_v46 = vpop.eup %2859  ;;  %v1167_v55 = vmul.f32 0.1, %v2127_v29  ;;  %v852_v19 = vmax.f32 %v3466_v35, 0.0  ;;  %2871 = vpow2.f32 %v1022_v36  ;;  %v3534_v30 = vadd.f32 %v3200_v44, %v3468_v8 }
 0x150   : > { %v3528_v10 = vpop.f32.mrf.mxu0  ;;  %v2862_v63 = vpop.eup %2861  ;;  %v1229_v60 = vadd.f32 %v1165_v7, %v845_v16  ;;  %2873 = vpow2.f32 %v1026_v59  ;;  %v922_v45 = vmul.f32 10.0, %v794_v9  ;;  %v1275_v20 = vpack.c.bf16 %v1227_v1, %v1226_v42 }
 0x151   : > { %v2864_v18 = vpop.eup %2863  ;;  %v1166_v31 = vmul.f32 0.1, %v2126_v34  ;;  %v855_v24 = vmax.f32 %v3471_v58, 0.0  ;;  %v923_v39 = vmul.f32 10.0, %v795_v23  ;;  %v793_v25 = vmin.f32 %v3534_v30, 0.0 }
 0x152   : > { %v3538_v43 = vpop.f32.mrf.mxu0  ;;  %v1228_v33 = vadd.f32 %v1164_v62, %v844_v57  ;;  %v2129_v48 = vadd.f32 -1.0, %v2862_v63  ;;  %v1028_v8 = vmul.f32 1.442695, %v920_v49  ;;  %2683 = vmatmul.mubr.bf16.gmra.mxu1 %v1275_v20  ;;  %v3544_v16 = vadd.f32 %v3477_v12, %v3200_v44 }
 0x153   : > { %v1231_v28 = vadd.f32 %v1167_v55, %v847_v4  ;;  %v921_v15 = vmul.f32 10.0, %v793_v25  ;;  %v3555_v40 = vadd.f32 %v3551_v56, %v3483_v21  ;;  %v3559_v57 = vadd.f32 %v3551_v56, %v3490_v54 }
 0x154   : > { %v2866_v41 = vpop.eup %2865  ;;  %v2128_v44 = vadd.f32 -1.0, %v2860_v46  ;;  %v2131_v12 = vadd.f32 -1.0, %v2864_v18  ;;  %v1032_v14 = vmul.f32 1.442695, %v922_v45  ;;  %v1276_v0 = vpack.c.bf16 %v1229_v60, %v1228_v33  ;;  %v3566_v1 = vpop.f32.mrf.mxu0 }
 0x155   : > { %v1034_v4 = vmul.f32 1.442695, %v923_v39  ;;  %v1030_v42 = vmul.f32 1.442695, %v921_v15  ;;  %v796_v29 = vmin.f32 %v3555_v40, 0.0  ;;  %v3564_v59 = vadd.f32 %v3551_v56, %v3497_v17 }
 0x156   : > { %v1169_v21 = vmul.f32 0.1, %v2129_v48  ;;  %2875 = vpow2.f32 %v1028_v8  ;;  %v798_v54 = vmin.f32 %v3544_v16, 0.0  ;;  %v799_v7 = vmin.f32 %v3559_v57, 0.0  ;;  %2686 = vmatprep.mubr.bf16.mxu1 %v1276_v0  ;;  %v717_v63 = vpop.f32.mrf.mxu0 }
 0x157   : > { %v1230_v36 = vadd.f32 %v1166_v31, %v846_v3  ;;  %v853_v9 = vmax.f32 %v3495_v5, 0.0  ;;  %2877 = vpow2.f32 %v1030_v42  ;;  %v924_v34 = vmul.f32 10.0, %v796_v29 }
 0x158   : > { %v2130_v23 = vadd.f32 -1.0, %v2866_v41  ;;  %v1168_v62 = vmul.f32 0.1, %v2128_v44  ;;  %v1171_v17 = vmul.f32 0.1, %v2131_v12  ;;  %2879 = vpow2.f32 %v1032_v14  ;;  %v2633_v44 = vpop.f32.mrf.mxu0 }
 0x159   : > { %2881 = vpow2.f32 %v1034_v4  ;;  %v1036_v49 = vmul.f32 1.442695, %v924_v34  ;;  %v927_v46 = vmul.f32 10.0, %v799_v7  ;;  %v797_v55 = vmin.f32 %v3564_v59, 0.0 }
 0x15a   : > { %v2868_v60 = vpop.eup %2867  ;;  %v1233_v45 = vadd.f32 %v1169_v21, %v849_v22  ;;  %v926_v37 = vmul.f32 10.0, %v798_v54  ;;  %v1277_v3 = vpack.c.bf16 %v1231_v28, %v1230_v36  ;;  %v3578_v20 = vadd.f32 %v3551_v56, %v3510_v6  ;;  %v720_v36 = vpop.f32.mrf.mxu0 }
 0x15b   : > { %v2870_v18 = vpop.eup %2869  ;;  %v858_v31 = vmax.f32 %v3504_v51, 0.0  ;;  %2883 = vpow2.f32 %v1036_v49  ;;  %v925_v39 = vmul.f32 10.0, %v797_v55  ;;  %v3583_v25 = vadd.f32 %v3551_v56, %v3518_v52 }
 0x15c   : > { %v2872_v33 = vpop.eup %2871  ;;  %v1170_v48 = vmul.f32 0.1, %v2130_v23  ;;  %v1232_v26 = vadd.f32 %v1168_v62, %v848_v47  ;;  %v1235_v22 = vadd.f32 %v1171_v17, %v851_v53  ;;  %2687 = vmatmul.mubr.bf16.gmra.mxu1 %v1277_v3  ;;  %v802_v6 = vmin.f32 %v3578_v20, 0.0 }
 0x15d   : > { %v2874_v8 = vpop.eup %2873  ;;  %v1042_v28 = vmul.f32 1.442695, %v927_v46  ;;  %v1038_v15 = vmul.f32 1.442695, %v925_v39  ;;  %v800_v41 = vmin.f32 %v3583_v25, 0.0  ;;  %v3593_v52 = vadd.f32 %v3551_v56, %v3528_v10 }
 0x15e   : > { %v2134_v12 = vadd.f32 -1.0, %v2868_v60  ;;  %v2132_v14 = vadd.f32 -1.0, %v2870_v18  ;;  %v1040_v32 = vmul.f32 1.442695, %v926_v37  ;;  %v1278_v47 = vpack.c.bf16 %v1233_v45, %v1232_v26 }
 0x15f   : > { %v2133_v0 = vadd.f32 -1.0, %v2872_v33  ;;  %2885 = vpow2.f32 %v1038_v15  ;;  %v928_v2 = vmul.f32 10.0, %v800_v41  ;;  %v803_v53 = vmin.f32 %v3593_v52, 0.0  ;;  %v2636_v33 = vpop.f32.mrf.mxu0 }
 0x160   : > { %v2135_v4 = vadd.f32 -1.0, %v2874_v8  ;;  %v856_v42 = vmax.f32 %v3508_v11, 0.0  ;;  %v859_v29 = vmax.f32 %v3515_v50, 0.0  ;;  %v930_v21 = vmul.f32 10.0, %v802_v6  ;;  %2690 = vmatprep.mubr.bf16.mxu1 %v1278_v47 }
 0x161   : > { %v1234_v10 = vadd.f32 %v1170_v48, %v850_v13  ;;  %2887 = vpow2.f32 %v1042_v28  ;;  %v1044_v54 = vmul.f32 1.442695, %v928_v2  ;;  %v931_v7 = vmul.f32 10.0, %v803_v53  ;;  %v733_v47 = vpop.f32.mrf.mxu0 }
 0x162   : > { %v1172_v34 = vmul.f32 0.1, %v2132_v14  ;;  %v857_v23 = vmax.f32 %v3534_v30, 0.0  ;;  %2889 = vpow2.f32 %v1040_v32  ;;  %v3603_v62 = vadd.f32 %v3551_v56, %v3538_v43 }
 0x163   : > { %v2876_v17 = vpop.eup %2875  ;;  %v1174_v49 = vmul.f32 0.1, %v2134_v12  ;;  %v1173_v46 = vmul.f32 0.1, %v2133_v0  ;;  %2891 = vpow2.f32 %v1044_v54  ;;  %v1279_v55 = vpack.c.bf16 %v1235_v22, %v1234_v10 }
 0x164   : > { %v2878_v60 = vpop.eup %2877  ;;  %v1175_v27 = vmul.f32 0.1, %v2135_v4  ;;  %v1048_v13 = vmul.f32 1.442695, %v930_v21  ;;  %v801_v45 = vmin.f32 %v3603_v62, 0.0  ;;  %v3608_v37 = vadd.f32 %v3551_v56, %v3566_v1 }
 0x165   : > { %v2880_v30 = vpop.eup %2879  ;;  %v2137_v3 = vadd.f32 -1.0, %v2878_v60  ;;  %v1050_v18 = vmul.f32 1.442695, %v931_v7  ;;  %2691 = vmatmul.mubr.bf16.gmra.mxu1 %v1279_v55  ;;  %v3611_v43 = vadd.f32 %v3551_v56, %v717_v63  ;;  %v3614_v39 = vadd.f32 %v3551_v56, %v2633_v44 }
 0x166   : > { %v2882_v48 = vpop.eup %2881  ;;  %v1236_v26 = vadd.f32 %v1172_v34, %v852_v19  ;;  %v2136_v22 = vadd.f32 -1.0, %v2876_v17  ;;  %v860_v6 = vmax.f32 %v3555_v40, 0.0  ;;  %v929_v1 = vmul.f32 10.0, %v801_v45 }
 0x167   : > { %v1237_v8 = vadd.f32 %v1173_v46, %v853_v9  ;;  %v806_v28 = vmin.f32 %v3608_v37, 0.0  ;;  %v804_v63 = vmin.f32 %v3611_v43, 0.0  ;;  %v807_v15 = vmin.f32 %v3614_v39, 0.0 }
 0x168   : > { %v2884_v41 = vpop.eup %2883  ;;  %v1239_v44 = vadd.f32 %v1175_v27, %v855_v24  ;;  %v1177_v12 = vmul.f32 0.1, %v2137_v3  ;;  %2893 = vpow2.f32 %v1048_v13  ;;  %v1046_v35 = vmul.f32 1.442695, %v929_v1 }
 0x169   : > { %v2138_v19 = vadd.f32 -1.0, %v2880_v30  ;;  %v2139_v14 = vadd.f32 -1.0, %v2882_v48  ;;  %2895 = vpow2.f32 %v1050_v18  ;;  %v932_v32 = vmul.f32 10.0, %v804_v63 }
 0x16a   : > { %v1238_v5 = vadd.f32 %v1174_v49, %v854_v38  ;;  %v1176_v9 = vmul.f32 0.1, %v2136_v22  ;;  %2897 = vpow2.f32 %v1046_v35  ;;  %v935_v0 = vmul.f32 10.0, %v807_v15  ;;  %v2637_v38 = vpop.f32.mrf.mxu0 }
 0x16b   : > { %v2140_v2 = vadd.f32 -1.0, %v2884_v41  ;;  %v934_v53 = vmul.f32 10.0, %v806_v28  ;;  %v1052_v4 = vmul.f32 1.442695, %v932_v32  ;;  %v1280_v21 = vpack.c.bf16 %v1237_v8, %v1236_v26 }
 0x16c   : > { %v2886_v58 = vpop.eup %2885  ;;  %v1241_v24 = vadd.f32 %v1177_v12, %v857_v23  ;;  %v861_v10 = vmax.f32 %v3564_v59, 0.0  ;;  %v3630_v54 = vadd.f32 %v3551_v56, %v720_v36  ;;  %v1281_v7 = vpack.c.bf16 %v1239_v44, %v1238_v5  ;;  %v736_v44 = vpop.f32.mrf.mxu0 }
 0x16d   : > { %v1178_v34 = vmul.f32 0.1, %v2138_v19  ;;  %v1179_v17 = vmul.f32 0.1, %v2139_v14  ;;  %v2141_v46 = vadd.f32 -1.0, %v2886_v58  ;;  %2694 = vmatprep.mubr.bf16.mxu1 %v1280_v21  ;;  %v3633_v61 = vadd.f32 %v3551_v56, %v2636_v33 }
 0x16e   : > { %v2888_v49 = vpop.eup %2887  ;;  %v1240_v55 = vadd.f32 %v1176_v9, %v856_v42  ;;  %2899 = vpow2.f32 %v1052_v4  ;;  %v1058_v23 = vmul.f32 1.442695, %v935_v0  ;;  %v805_v59 = vmin.f32 %v3630_v54, 0.0  ;;  %2695 = vmatmul.mubr.bf16.gmra.mxu1 %v1281_v7 }
 0x16f   : > { %v2890_v36 = vpop.eup %2889  ;;  %v1180_v60 = vmul.f32 0.1, %v2140_v2  ;;  %v1181_v27 = vmul.f32 0.1, %v2141_v46  ;;  %v1056_v13 = vmul.f32 1.442695, %v934_v53  ;;  %v3639_v45 = vadd.f32 %v3551_v56, %v733_v47 }
 0x170   : > { %v2892_v30 = vpop.eup %2891  ;;  %v933_v3 = vmul.f32 10.0, %v805_v59  ;;  %v810_v18 = vmin.f32 %v3633_v61, 0.0  ;;  %v3643_v33 = vadd.f32 %v3551_v56, %v2637_v38  ;;  %v1282_v11 = vpack.c.bf16 %v1241_v24, %v1240_v55 }
 0x171   : > { %v1242_v42 = vadd.f32 %v1178_v34, %v858_v31  ;;  %v1243_v48 = vadd.f32 %v1179_v17, %v859_v29  ;;  %v2143_v26 = vadd.f32 -1.0, %v2888_v49  ;;  %v808_v22 = vmin.f32 %v3639_v45, 0.0 }
 0x172   : > { %v1245_v1 = vadd.f32 %v1181_v27, %v861_v10  ;;  %2901 = vpow2.f32 %v1058_v23  ;;  %v1054_v8 = vmul.f32 1.442695, %v933_v3  ;;  %v811_v28 = vmin.f32 %v3643_v33, 0.0  ;;  %2698 = vmatprep.mubr.bf16.mxu1 %v1282_v11 }
 0x173   : > { %v2142_v63 = vadd.f32 -1.0, %v2890_v36  ;;  %v2144_v15 = vadd.f32 -1.0, %v2892_v30  ;;  %2903 = vpow2.f32 %v1056_v13  ;;  %v936_v41 = vmul.f32 10.0, %v808_v22 }
 0x174   : > { %v1244_v51 = vadd.f32 %v1180_v60, %v860_v6  ;;  %2905 = vpow2.f32 %v1054_v8  ;;  %v938_v50 = vmul.f32 10.0, %v810_v18  ;;  %v939_v31 = vmul.f32 10.0, %v811_v28 }
 0x175   : > { %v2894_v29 = vpop.eup %2893  ;;  %v1183_v12 = vmul.f32 0.1, %v2143_v26  ;;  %v1060_v35 = vmul.f32 1.442695, %v936_v41  ;;  %v3654_v32 = vadd.f32 %v3551_v56, %v736_v44  ;;  %v1283_v47 = vpack.c.bf16 %v1243_v48, %v1242_v42 }
 0x176   : > { %v2896_v19 = vpop.eup %2895  ;;  %v1066_v14 = vmul.f32 1.442695, %v939_v31  ;;  %v1284_v5 = vpack.c.bf16 %v1245_v1, %v1244_v51  ;;  %v1182_v0 = vmul.f32 0.1, %v2142_v63  ;;  %v863_v2 = vmax.f32 %v3559_v57, 0.0 }
 0x177   : > { %v2898_v9 = vpop.eup %2897  ;;  %v1184_v53 = vmul.f32 0.1, %v2144_v15  ;;  %v1064_v6 = vmul.f32 1.442695, %v938_v50  ;;  %2907 = vpow2.f32 %v1060_v35  ;;  %v809_v4 = vmin.f32 %v3654_v32, 0.0  ;;  %2699 = vmatmul.mubr.bf16.gmra.mxu1 %v1283_v47 }
 0x178   : > { %v2145_v40 = vadd.f32 -1.0, %v2898_v9  ;;  %v862_v21 = vmax.f32 %v3544_v16, 0.0  ;;  %v864_v58 = vmax.f32 %v3583_v25, 0.0  ;;  %v2147_v24 = vadd.f32 -1.0, %v2896_v19  ;;  %2702 = vmatprep.mubr.bf16.mxu1 %v1284_v5 }
 0x179   : > { %v865_v56 = vmax.f32 %v3603_v62, 0.0  ;;  %v1247_v10 = vadd.f32 %v1183_v12, %v863_v2  ;;  %2909 = vpow2.f32 %v1066_v14  ;;  %v937_v34 = vmul.f32 10.0, %v809_v4 }
 0x17a   : > { %v1185_v7 = vmul.f32 0.1, %v2145_v40  ;;  %v1246_v17 = vadd.f32 %v1182_v0, %v862_v21  ;;  %v2146_v46 = vadd.f32 -1.0, %v2894_v29  ;;  %v1248_v38 = vadd.f32 %v1184_v53, %v864_v58 }
 0x17b   : > { %v2900_v57 = vpop.eup %2899  ;;  %2911 = vpow2.f32 %v1064_v6  ;;  %v1062_v55 = vmul.f32 1.442695, %v937_v34  ;;  %v1187_v23 = vmul.f32 0.1, %v2147_v24  ;;  %v867_v27 = vmax.f32 %v3593_v52, 0.0 }
 0x17c   : > { %v1249_v49 = vadd.f32 %v1185_v7, %v865_v56  ;;  %v2148_v59 = vadd.f32 -1.0, %v2900_v57  ;;  %v1285_v16 = vpack.c.bf16 %v1247_v10, %v1246_v17  ;;  %v1186_v62 = vmul.f32 0.1, %v2146_v46 }
 0x17d   : > { %2913 = vpow2.f32 %v1062_v55  ;;  %v866_v30 = vmax.f32 %v3578_v20, 0.0  ;;  %v1251_v3 = vadd.f32 %v1187_v23, %v867_v27  ;;  %v868_v48 = vmax.f32 %v3611_v43, 0.0 }
 0x17e   : > { %v1286_v25 = vpack.c.bf16 %v1249_v49, %v1248_v38  ;;  %v1188_v18 = vmul.f32 0.1, %v2148_v59  ;;  %v869_v1 = vmax.f32 %v3630_v54, 0.0  ;;  %v871_v20 = vmax.f32 %v3614_v39, 0.0 }
 0x17f   : > { %v2902_v36 = vpop.eup %2901  ;;  %2703 = vmatmul.mubr.bf16.gmra.mxu1 %v1285_v16  ;;  %v1250_v26 = vadd.f32 %v1186_v62, %v866_v30  ;;  %v870_v43 = vmax.f32 %v3608_v37, 0.0  ;;  %v872_v9 = vmax.f32 %v3639_v45, 0.0  ;;  %v873_v2 = vmax.f32 %v3654_v32, 0.0  ;;  %v3675_v32 = vld [vmem:[%s3832_s4] ss:$0 sm:$0xff] }
 0x180   : > { %v2904_v60 = vpop.eup %2903  ;;  %2706 = vmatprep.mubr.bf16.mxu1 %v1286_v25  ;;  %v2151_v11 = vadd.f32 -1.0, %v2902_v36  ;;  %v1252_v63 = vadd.f32 %v1188_v18, %v868_v48  ;;  %v875_v37 = vmax.f32 %v3643_v33, 0.0  ;;  %v874_v21 = vmax.f32 %v3633_v61, 0.0 }
 0x181   : > { %v2906_v13 = vpop.eup %2905  ;;  %v2150_v22 = vadd.f32 -1.0, %v2904_v60  ;;  %v1287_v41 = vpack.c.bf16 %v1251_v3, %v1250_v26 }
 0x182   : > { %v2149_v42 = vadd.f32 -1.0, %v2906_v13  ;;  %v1191_v15 = vmul.f32 0.1, %v2151_v11 }
 0x183   : > { %v1190_v51 = vmul.f32 0.1, %v2150_v22 }
 0x184   : > { %v1189_v8 = vmul.f32 0.1, %v2149_v42  ;;  %v2908_v28 = vpop.eup %2907  ;;  %v1255_v12 = vadd.f32 %v1191_v15, %v871_v20 }
 0x185   : > { %v2152_v50 = vadd.f32 -1.0, %v2908_v28  ;;  %v1254_v19 = vadd.f32 %v1190_v51, %v870_v43 }
 0x186   : > { %v1253_v52 = vadd.f32 %v1189_v8, %v869_v1  ;;  %v2910_v44 = vpop.eup %2909 }
 0x187   : > { %2707 = vmatmul.mubr.bf16.gmra.mxu1 %v1287_v41  ;;  %v2155_v35 = vadd.f32 -1.0, %v2910_v44  ;;  %v1192_v47 = vmul.f32 0.1, %v2152_v50  ;;  %v1289_v53 = vpack.c.bf16 %v1255_v12, %v1254_v19 }
 0x188   : > { %v1288_v31 = vpack.c.bf16 %v1253_v52, %v1252_v63  ;;  %v2912_v29 = vpop.eup %2911 }
 0x189   : > { %v2154_v14 = vadd.f32 -1.0, %v2912_v29  ;;  %v1195_v0 = vmul.f32 0.1, %v2155_v35  ;;  %v1256_v6 = vadd.f32 %v1192_v47, %v872_v9 }
 0x18a   : > { %2710 = vmatprep.mubr.bf16.mxu1 %v1288_v31  ;;  %v2914_v54 = vpop.eup %2913 }
 0x18b   : > { %v2153_v5 = vadd.f32 -1.0, %v2914_v54  ;;  %v1194_v40 = vmul.f32 0.1, %v2154_v14  ;;  %v1259_v58 = vadd.f32 %v1195_v0, %v875_v37 }
 0x18d   : > { %v1193_v39 = vmul.f32 0.1, %v2153_v5  ;;  %v1258_v56 = vadd.f32 %v1194_v40, %v874_v21 }
 0x18f   : > { %v1257_v4 = vadd.f32 %v1193_v39, %v873_v2  ;;  %2711 = vmatmul.mubr.bf16.gmra.mxu1 %v1289_v53  ;;  %v1291_v45 = vpack.c.bf16 %v1259_v58, %v1258_v56 }
 0x191   : > { %v1290_v24 = vpack.c.bf16 %v1257_v4, %v1256_v6 }
 0x193   : > { %2714 = vmatprep.mubr.bf16.mxu1 %v1290_v24 }
 0x197   : > { %2715 = vmatmul.mubr.bf16.gmra.mxu1 %v1291_v45 }
 0x1ca   : > { %v2656_v10 = vpop.f32.mrf.mxu0 }
 0x1cb   : > { %v1406_v34 = vadd.f32 %v2656_v10, %v3675_v32 }
 0x1cc   : > { %v1397_v7 = vpop.f32.mrf.mxu0 }
 0x1cd   : > { %v1398_v17 = vadd.f32 %v3675_v32, %v1397_v7 }
 0x1ce   : > { %v2657_v33 = vpop.f32.mrf.mxu0 }
 0x1cf   : > { %v1409_v61 = vadd.f32 %v2657_v33, %v3675_v32 }
 0x1d0   : > { %v1400_v57 = vpop.f32.mrf.mxu0 }
 0x1d1   : > { %v2307_v46 = vpack.c.bf16 %v1409_v61, %v1406_v34  ;;  %v1401_v38 = vadd.f32 %v3675_v32, %v1400_v57 }
 0x1d3   : > { %2459 = vst [vmem:[%s3683_s10 + $0x8] sm:$0xff] %v2307_v46   ;;  %v2302_v49 = vpack.c.bf16 %v1401_v38, %v1398_v17 }
 0x1d5   : > { %2303 = vst [vmem:[%s3683_s10] sm:$0xff] %v2302_v49  }
 0x1dd   : > { %v2660_v55 = vpop.f32.mrf.mxu1 }
 0x1de   : > { %v1422_v16 = vadd.f32 %v2660_v55, %v3675_v32 }
 0x1df   : > { %v1413_v23 = vpop.f32.mrf.mxu1 }
 0x1e0   : > { %v1414_v60 = vadd.f32 %v3675_v32, %v1413_v23 }
 0x1e1   : > { %v2661_v59 = vpop.f32.mrf.mxu1 }
 0x1e2   : > { %v1425_v25 = vadd.f32 %v2661_v59, %v3675_v32 }
 0x1e3   : > { %v1416_v36 = vpop.f32.mrf.mxu1 }
 0x1e4   : > { %v2317_v62 = vpack.c.bf16 %v1425_v25, %v1422_v16  ;;  %v1417_v27 = vadd.f32 %v3675_v32, %v1416_v36 }
 0x1e5   : > { %v2664_v13 = vpop.f32.mrf.mxu1 }
 0x1e6   : > { %2461 = vst [vmem:[%s3683_s10 + $0x18] sm:$0xff] %v2317_v62   ;;  %v2312_v30 = vpack.c.bf16 %v1417_v27, %v1414_v60  ;;  %v1438_v11 = vadd.f32 %v2664_v13, %v3675_v32 }
 0x1e7   : > { %v1429_v3 = vpop.f32.mrf.mxu1 }
 0x1e8   : > { %2460 = vst [vmem:[%s3683_s10 + $0x10] sm:$0xff] %v2312_v30   ;;  %v1430_v26 = vadd.f32 %v3675_v32, %v1429_v3 }
 0x1e9   : > { %v2665_v18 = vpop.f32.mrf.mxu1 }
 0x1ea   : > { %v1441_v42 = vadd.f32 %v2665_v18, %v3675_v32 }
 0x1eb   : > { %v1432_v48 = vpop.f32.mrf.mxu1 }
 0x1ec   : > { %v2327_v22 = vpack.c.bf16 %v1441_v42, %v1438_v11  ;;  %v1433_v1 = vadd.f32 %v3675_v32, %v1432_v48 }
 0x1ed   : > { %v2668_v8 = vpop.f32.mrf.mxu1 }
 0x1ee   : > { %2463 = vst [vmem:[%s3683_s10 + $0x28] sm:$0xff] %v2327_v22   ;;  %v2322_v28 = vpack.c.bf16 %v1433_v1, %v1430_v26  ;;  %v1454_v52 = vadd.f32 %v2668_v8, %v3675_v32 }
 0x1ef   : > { %v1445_v63 = vpop.f32.mrf.mxu1 }
 0x1f0   : > { %2462 = vst [vmem:[%s3683_s10 + $0x20] sm:$0xff] %v2322_v28   ;;  %v1446_v51 = vadd.f32 %v3675_v32, %v1445_v63 }
 0x1f1   : > { %v2669_v15 = vpop.f32.mrf.mxu1 }
 0x1f2   : > { %v1457_v41 = vadd.f32 %v2669_v15, %v3675_v32 }
 0x1f3   : > { %v1448_v44 = vpop.f32.mrf.mxu1 }
 0x1f4   : > { %v2337_v20 = vpack.c.bf16 %v1457_v41, %v1454_v52  ;;  %v1449_v50 = vadd.f32 %v3675_v32, %v1448_v44 }
 0x1f6   : > { %2465 = vst [vmem:[%s3683_s10 + $0x38] sm:$0xff] %v2337_v20   ;;  %v2332_v31 = vpack.c.bf16 %v1449_v50, %v1446_v51  ;;  %v2672_v29 = vpop.f32.mrf.mxu1 }
 0x1f7   : > { %v1470_v35 = vadd.f32 %v2672_v29, %v3675_v32 }
 0x1f8   : > { %2464 = vst [vmem:[%s3683_s10 + $0x30] sm:$0xff] %v2332_v31   ;;  %v1461_v43 = vpop.f32.mrf.mxu1 }
 0x1f9   : > { %v1462_v14 = vadd.f32 %v3675_v32, %v1461_v43 }
 0x1fa   : > { %v2673_v12 = vpop.f32.mrf.mxu1 }
 0x1fb   : > { %v1473_v54 = vadd.f32 %v2673_v12, %v3675_v32 }
 0x1fc   : > { %v1464_v19 = vpop.f32.mrf.mxu1 }
 0x1fd   : > { %v2347_v47 = vpack.c.bf16 %v1473_v54, %v1470_v35  ;;  %v1465_v5 = vadd.f32 %v3675_v32, %v1464_v19 }
 0x1fe   : > { %v2676_v9 = vpop.f32.mrf.mxu1 }
 0x1ff   : > { %2467 = vst [vmem:[%s3683_s10 + $0x48] sm:$0xff] %v2347_v47   ;;  %v2342_v0 = vpack.c.bf16 %v1465_v5, %v1462_v14  ;;  %v1486_v53 = vadd.f32 %v2676_v9, %v3675_v32 }
 0x200   : > { %v1477_v2 = vpop.f32.mrf.mxu1 }
 0x201   : > { %2466 = vst [vmem:[%s3683_s10 + $0x40] sm:$0xff] %v2342_v0   ;;  %v1478_v37 = vadd.f32 %v3675_v32, %v1477_v2 }
 0x202   : > { %v2677_v39 = vpop.f32.mrf.mxu1 }
 0x203   : > { %v1489_v40 = vadd.f32 %v2677_v39, %v3675_v32 }
 0x204   : > { %v1480_v6 = vpop.f32.mrf.mxu1 }
 0x205   : > { %v2357_v4 = vpack.c.bf16 %v1489_v40, %v1486_v53  ;;  %v1481_v21 = vadd.f32 %v3675_v32, %v1480_v6 }
 0x207   : > { %2469 = vst [vmem:[%s3683_s10 + $0x58] sm:$0xff] %v2357_v4   ;;  %v2352_v58 = vpack.c.bf16 %v1481_v21, %v1478_v37 }
 0x208   : > { %v2680_v24 = vpop.f32.mrf.mxu1 }
 0x209   : > { %2468 = vst [vmem:[%s3683_s10 + $0x50] sm:$0xff] %v2352_v58   ;;  %v1502_v10 = vadd.f32 %v2680_v24, %v3675_v32 }
 0x20a   : > { %v1493_v56 = vpop.f32.mrf.mxu1 }
 0x20b   : > { %v1494_v34 = vadd.f32 %v3675_v32, %v1493_v56 }
 0x20c   : > { %v2681_v45 = vpop.f32.mrf.mxu1 }
 0x20d   : > { %v1505_v7 = vadd.f32 %v2681_v45, %v3675_v32 }
 0x20e   : > { %v1496_v33 = vpop.f32.mrf.mxu1 }
 0x20f   : > { %v2367_v61 = vpack.c.bf16 %v1505_v7, %v1502_v10  ;;  %v1497_v57 = vadd.f32 %v3675_v32, %v1496_v33 }
 0x211   : > { %2471 = vst [vmem:[%s3683_s10 + $0x68] sm:$0xff] %v2367_v61   ;;  %v2362_v17 = vpack.c.bf16 %v1497_v57, %v1494_v34 }
 0x212   : > { %v2684_v46 = vpop.f32.mrf.mxu1 }
 0x213   : > { %2470 = vst [vmem:[%s3683_s10 + $0x60] sm:$0xff] %v2362_v17   ;;  %v1518_v55 = vadd.f32 %v2684_v46, %v3675_v32 }
 0x214   : > { %v1509_v38 = vpop.f32.mrf.mxu1 }
 0x215   : > { %v1510_v16 = vadd.f32 %v3675_v32, %v1509_v38 }
 0x216   : > { %v2685_v49 = vpop.f32.mrf.mxu1 }
 0x217   : > { %v1521_v23 = vadd.f32 %v2685_v49, %v3675_v32 }
 0x218   : > { %v1512_v59 = vpop.f32.mrf.mxu1 }
 0x219   : > { %v2377_v25 = vpack.c.bf16 %v1521_v23, %v1518_v55  ;;  %v1513_v36 = vadd.f32 %v3675_v32, %v1512_v59 }
 0x21b   : > { %2473 = vst [vmem:[%s3683_s10 + $0x78] sm:$0xff] %v2377_v25   ;;  %v2372_v60 = vpack.c.bf16 %v1513_v36, %v1510_v16 }
 0x21c   : > { %v2688_v62 = vpop.f32.mrf.mxu1 }
 0x21d   : > { %2472 = vst [vmem:[%s3683_s10 + $0x70] sm:$0xff] %v2372_v60   ;;  %v1534_v30 = vadd.f32 %v2688_v62, %v3675_v32 }
 0x21e   : > { %v1525_v27 = vpop.f32.mrf.mxu1 }
 0x21f   : > { %v1526_v11 = vadd.f32 %v3675_v32, %v1525_v27 }
 0x220   : > { %v2689_v13 = vpop.f32.mrf.mxu1 }
 0x221   : > { %v1537_v3 = vadd.f32 %v2689_v13, %v3675_v32 }
 0x222   : > { %v1528_v18 = vpop.f32.mrf.mxu1 }
 0x223   : > { %v2387_v42 = vpack.c.bf16 %v1537_v3, %v1534_v30  ;;  %v1529_v48 = vadd.f32 %v3675_v32, %v1528_v18 }
 0x225   : > { %2475 = vst [vmem:[%s3683_s10 + $0x88] sm:$0xff] %v2387_v42   ;;  %v2382_v26 = vpack.c.bf16 %v1529_v48, %v1526_v11  ;;  %v2692_v22 = vpop.f32.mrf.mxu1 }
 0x226   : > { %v1550_v28 = vadd.f32 %v2692_v22, %v3675_v32 }
 0x227   : > { %2474 = vst [vmem:[%s3683_s10 + $0x80] sm:$0xff] %v2382_v26   ;;  %v1541_v1 = vpop.f32.mrf.mxu1 }
 0x228   : > { %v1542_v52 = vadd.f32 %v3675_v32, %v1541_v1 }
 0x229   : > { %v2693_v8 = vpop.f32.mrf.mxu1 }
 0x22a   : > { %v1553_v63 = vadd.f32 %v2693_v8, %v3675_v32 }
 0x22b   : > { %v1544_v15 = vpop.f32.mrf.mxu1 }
 0x22c   : > { %v2397_v41 = vpack.c.bf16 %v1553_v63, %v1550_v28  ;;  %v1545_v44 = vadd.f32 %v3675_v32, %v1544_v15 }
 0x22e   : > { %2477 = vst [vmem:[%s3683_s10 + $0x98] sm:$0xff] %v2397_v41   ;;  %v2392_v51 = vpack.c.bf16 %v1545_v44, %v1542_v52  ;;  %v2696_v20 = vpop.f32.mrf.mxu1 }
 0x22f   : > { %v1566_v29 = vadd.f32 %v2696_v20, %v3675_v32 }
 0x230   : > { %2476 = vst [vmem:[%s3683_s10 + $0x90] sm:$0xff] %v2392_v51   ;;  %v1557_v50 = vpop.f32.mrf.mxu1 }
 0x231   : > { %v1558_v35 = vadd.f32 %v3675_v32, %v1557_v50 }
 0x232   : > { %v2697_v31 = vpop.f32.mrf.mxu1 }
 0x233   : > { %v1569_v43 = vadd.f32 %v2697_v31, %v3675_v32 }
 0x234   : > { %v1560_v12 = vpop.f32.mrf.mxu1 }
 0x235   : > { %v2407_v54 = vpack.c.bf16 %v1569_v43, %v1566_v29  ;;  %v1561_v19 = vadd.f32 %v3675_v32, %v1560_v12 }
 0x237   : > { %2479 = vst [vmem:[%s3683_s10 + $0xa8] sm:$0xff] %v2407_v54   ;;  %v2402_v14 = vpack.c.bf16 %v1561_v19, %v1558_v35  ;;  %v2700_v47 = vpop.f32.mrf.mxu1 }
 0x238   : > { %v1582_v0 = vadd.f32 %v2700_v47, %v3675_v32 }
 0x239   : > { %2478 = vst [vmem:[%s3683_s10 + $0xa0] sm:$0xff] %v2402_v14   ;;  %v1573_v5 = vpop.f32.mrf.mxu1 }
 0x23a   : > { %v1574_v53 = vadd.f32 %v3675_v32, %v1573_v5 }
 0x23b   : > { %v2701_v9 = vpop.f32.mrf.mxu1 }
 0x23c   : > { %v1585_v2 = vadd.f32 %v2701_v9, %v3675_v32 }
 0x23d   : > { %v1576_v39 = vpop.f32.mrf.mxu1 }
 0x23e   : > { %v2417_v40 = vpack.c.bf16 %v1585_v2, %v1582_v0  ;;  %v1577_v6 = vadd.f32 %v3675_v32, %v1576_v39 }
 0x23f   : > { %v2704_v37 = vpop.f32.mrf.mxu1 }
 0x240   : > { %2481 = vst [vmem:[%s3683_s10 + $0xb8] sm:$0xff] %v2417_v40   ;;  %v2412_v4 = vpack.c.bf16 %v1577_v6, %v1574_v53  ;;  %v1598_v24 = vadd.f32 %v2704_v37, %v3675_v32 }
 0x241   : > { %v1589_v21 = vpop.f32.mrf.mxu1 }
 0x242   : > { %2480 = vst [vmem:[%s3683_s10 + $0xb0] sm:$0xff] %v2412_v4   ;;  %v1590_v10 = vadd.f32 %v3675_v32, %v1589_v21 }
 0x243   : > { %v2705_v58 = vpop.f32.mrf.mxu1 }
 0x244   : > { %v1601_v56 = vadd.f32 %v2705_v58, %v3675_v32 }
 0x245   : > { %v1592_v45 = vpop.f32.mrf.mxu1 }
 0x246   : > { %v2427_v7 = vpack.c.bf16 %v1601_v56, %v1598_v24  ;;  %v1593_v33 = vadd.f32 %v3675_v32, %v1592_v45 }
 0x247   : > { %v2708_v34 = vpop.f32.mrf.mxu1 }
 0x248   : > { %2483 = vst [vmem:[%s3683_s10 + $0xc8] sm:$0xff] %v2427_v7   ;;  %v2422_v61 = vpack.c.bf16 %v1593_v33, %v1590_v10  ;;  %v1614_v46 = vadd.f32 %v2708_v34, %v3675_v32 }
 0x249   : > { %v1605_v57 = vpop.f32.mrf.mxu1 }
 0x24a   : > { %2482 = vst [vmem:[%s3683_s10 + $0xc0] sm:$0xff] %v2422_v61   ;;  %v1606_v55 = vadd.f32 %v3675_v32, %v1605_v57 }
 0x24b   : > { %v2709_v17 = vpop.f32.mrf.mxu1 }
 0x24c   : > { %v1617_v38 = vadd.f32 %v2709_v17, %v3675_v32 }
 0x24d   : > { %v1608_v49 = vpop.f32.mrf.mxu1 }
 0x24e   : > { %v2437_v23 = vpack.c.bf16 %v1617_v38, %v1614_v46  ;;  %v1609_v59 = vadd.f32 %v3675_v32, %v1608_v49 }
 0x24f   : > { %v2712_v16 = vpop.f32.mrf.mxu1 }
 0x250   : > { %2485 = vst [vmem:[%s3683_s10 + $0xd8] sm:$0xff] %v2437_v23   ;;  %v2432_v25 = vpack.c.bf16 %v1609_v59, %v1606_v55  ;;  %v1630_v62 = vadd.f32 %v2712_v16, %v3675_v32 }
 0x251   : > { %v1621_v36 = vpop.f32.mrf.mxu1 }
 0x252   : > { %2484 = vst [vmem:[%s3683_s10 + $0xd0] sm:$0xff] %v2432_v25   ;;  %v1622_v30 = vadd.f32 %v3675_v32, %v1621_v36 }
 0x253   : > { %v2713_v60 = vpop.f32.mrf.mxu1 }
 0x254   : > { %v1633_v27 = vadd.f32 %v2713_v60, %v3675_v32 }
 0x255   : > { %v1624_v13 = vpop.f32.mrf.mxu1 }
 0x256   : > { %v2447_v3 = vpack.c.bf16 %v1633_v27, %v1630_v62  ;;  %v1625_v18 = vadd.f32 %v3675_v32, %v1624_v13 }
 0x257   : > { %v2716_v11 = vpop.f32.mrf.mxu1 }
 0x258   : > { %2487 = vst [vmem:[%s3683_s10 + $0xe8] sm:$0xff] %v2447_v3   ;;  %v2442_v42 = vpack.c.bf16 %v1625_v18, %v1622_v30  ;;  %v1646_v22 = vadd.f32 %v2716_v11, %v3675_v32 }
 0x259   : > { %v1637_v48 = vpop.f32.mrf.mxu1 }
 0x25a   : > { %2486 = vst [vmem:[%s3683_s10 + $0xe0] sm:$0xff] %v2442_v42   ;;  %v1638_v28 = vadd.f32 %v3675_v32, %v1637_v48 }
 0x25b   : > { %v2717_v26 = vpop.f32.mrf.mxu1 }
 0x25c   : > { %v1649_v1 = vadd.f32 %v2717_v26, %v3675_v32 }
 0x25d   : > { %v1640_v8 = vpop.f32.mrf.mxu1 }
 0x25e   : > { %v2457_v63 = vpack.c.bf16 %v1649_v1, %v1646_v22  ;;  %v1641_v15 = vadd.f32 %v3675_v32, %v1640_v8 }
 0x260   : > { %2489 = vst [vmem:[%s3683_s10 + $0xf8] sm:$0xff] %v2457_v63   ;;  %v2452_v52 = vpack.c.bf16 %v1641_v15, %v1638_v28 }
 0x262   : > { %2488 = vst [vmem:[%s3683_s10 + $0xf0] sm:$0xff] %v2452_v52  }
 0x263   : > { %2929 = shalt.err (!%p2926_p3)
}
 0x264   : > { %s2930_s15 = scalar_lea.hbm %s3780_s16, 4096  ;;  %s2934_s7 = scalar_lea.hbm %s3833_s5, 8192 }
 0x265   : > { %p2931_p4 = scmp.ne.s32.totalorder %s3780_s16, %s2930_s15  ;;  %p2935_p9 = scmp.lt.s32.totalorder %s3780_s16, %s3833_s5 }
 0x266   : > { %p2936_p10 = scmp.lt.s32.totalorder %s2934_s7, %s2930_s15 }
 0x267   : > { %p2932_p7 = pnand %p2931_p4, %p3049_p5 }
 0x268   : > { %p2937_p11 = por %p2936_p10, %p2935_p9 }
 0x269   : > { %p2933_p8 = pneg %p2932_p7 }
 0x26b   : > { %p2938_p12 = pnand %p2937_p11, %p2933_p8 }
 0x26d   : > { %2941 = shalt.err (!%p2938_p12)
}
 0x26e   : > { %s2979_s10 = smov 64   ;;  %s2980_s11 = smov 4  }
 0x26f   : > { %2734 = dma.vmem_to_hbm [thread:$0]  (%p3049_p5), %s3782_s12, 4096, %s3780_s16, %s3788_s22, %s2979_s10, %s2979_s10, %s2980_s11  }
 0x270 PF: > { %p2740_p13 = scmp.ge.s32.totalorder %s2976_s21, 2  ;;  %s2001_s13 = sand.u32 1, %s2964_s18  }
 0x271   : > { %s2002_s14 = scalar_lea.sflag [#allocation3], %s2001_s13 }
 0x272   : > { %p2737_p0 = pnand %p2740_p13, %p3053_p6 }
 0x274   : > { %p2738_p1 = pneg %p2737_p0 }
 0x276   : > { %2959 = dma.done.wait (%p2738_p1), %s2002_s14, 4096  }
 0x277   : > { %2961 = vsyncadd (%p2738_p1), %s2002_s14, 4294963200  ;;  %p15_p2 = scmp.ge.s32.totalorder %s3036_s24, 4   ;;  %s3836_s18 = smov %s2968_s19 }
 0x278   : > { %s3837_s19 = smov %s2972_s20  ;;  %s3838_s20 = smov %s3047_s27 }
 0x279   : > { %s3839_s21 = smov %s3036_s24  ;;  %17 = sbr.rel (!%p15_p2) target bundleno = 3 (0x3), region = 75 }
 0x27e   :  { %2007 = vsyncpa [#allocation3], 1 }
 0x27f   :  { %2009 = vsyncpa [#allocation3 + $0x1], 1 }

</bundles_post_ra>
